<compile_context>
chip_gen: v5e
topology: v5e:2x2
jax: 0.10.0
libtpu: 0.0.40
codegen_flags: <defaults>
</compile_context>

<pallas_src>
import functools

import jax
import jax.numpy as jnp
from jax import lax
from jax.experimental import pallas as pl
from jax.experimental.pallas import tpu as pltpu

_EPS = 1e-8
_LANE = 128
_MAX_TILE = 1024  # pixels per tile (lane dim); keeps (256, tile) f32 temps ~1 MiB


def _round_up(x, m):
    return (x + m - 1) // m * m


# -----------------------------------------------------------------------------
# Shared per-pixel HSV / weighting math. x3: (3, tp) raw image values in [-1, 1]
# (pixels in lanes). Returns (1, tp) rows.
# -----------------------------------------------------------------------------
def _hsv_pieces(x3, sat_weight):
    r = x3[0:1, :]
    g = x3[1:2, :]
    b = x3[2:3, :]
    r01 = jnp.clip((r + 1.0) * 0.5, _EPS, 1.0 - _EPS)
    g01 = jnp.clip((g + 1.0) * 0.5, _EPS, 1.0 - _EPS)
    b01 = jnp.clip((b + 1.0) * 0.5, _EPS, 1.0 - _EPS)
    maxc = jnp.maximum(jnp.maximum(r01, g01), b01)
    minc = jnp.minimum(jnp.minimum(r01, g01), b01)
    d = maxc - minc
    val = maxc
    sat = d / maxc                                   # maxc >= _EPS > 0
    is_r = maxc == r01
    is_g = jnp.logical_and(jnp.logical_not(is_r), maxc == g01)
    is_b = jnp.logical_not(jnp.logical_or(is_r, is_g))
    num = jnp.where(is_r, g01 - b01, jnp.where(is_g, b01 - r01, r01 - g01))
    off = jnp.where(is_r, 0.0, jnp.where(is_g, 2.0, 4.0))
    d_safe = jnp.where(d > 0.0, d, 1.0)
    hue6 = (off + num / d_safe) * (1.0 / 6.0)
    hue = hue6 - jnp.floor(hue6)                     # frac -> [0, 1)
    hue = jnp.where(d > 0.0, hue, 0.0)
    if sat_weight:
        w = jnp.sqrt(sat * val)
    else:
        w = jnp.ones_like(hue)
    return dict(r=r, g=g, b=b, r01=r01, g01=g01, b01=b01, maxc=maxc, minc=minc,
                d=d, d_safe=d_safe, sat=sat, val=val, num=num,
                is_r=is_r, is_g=is_g, is_b=is_b, hue=hue, w=w)


def _bin_masks(hue, nbins, nb_pad):
    """Triangular-histogram bin membership. hue: (1, tp) -> masks (nb_pad, tp)."""
    delta = 1.0 / (nbins - 1)
    k = lax.broadcasted_iota(jnp.int32, (nb_pad, 1), 0)
    bin_k = k.astype(jnp.float32) * delta
    bin_n = bin_k + delta
    bin_p = bin_k - delta
    kvalid = k < nbins
    m_plus = ((hue >= bin_k) & (hue < bin_n) & kvalid).astype(jnp.float32)
    m_sub = ((hue >= bin_p) & (hue < bin_k) & (k >= 1) & kvalid).astype(jnp.float32)
    return m_plus, m_sub, bin_n, bin_p


# -----------------------------------------------------------------------------
# Kernel 1: fused RGB->HSV + weighting + soft-binning + per-batch reduction.
# Output: raw (un-normalised) histogram, accumulated across pixel tiles.
# -----------------------------------------------------------------------------
def _hist_kernel(img_ref, hist_ref, *, nbins, nb_pad, n_pix, tp, sat_weight):
    t = pl.program_id(1)

    @pl.when(t == 0)
    def _init():
        hist_ref[...] = jnp.zeros_like(hist_ref)

    x3 = img_ref[0]                                           # (3, tp)
    p = _hsv_pieces(x3, sat_weight)

    pix = t * tp + lax.broadcasted_iota(jnp.int32, (1, tp), 1)
    valid = (pix < n_pix).astype(jnp.float32)
    wv = p["w"] * valid                                       # (1, tp)

    m_plus, m_sub, bin_n, bin_p = _bin_masks(p["hue"], nbins, nb_pad)
    contrib = wv * (m_plus * (bin_n - p["hue"]) + m_sub * (p["hue"] - bin_p))
    hist_ref[0] = hist_ref[0] + jnp.sum(contrib, axis=1, keepdims=True)   # (nb_pad, 1)


# -----------------------------------------------------------------------------
# Kernel 2: fused analytic gradient d loss / d img given dloss/dhist_raw.
# -----------------------------------------------------------------------------
def _grad_kernel(img_ref, gh_ref, out_ref, *, nbins, nb_pad, n_pix, tp, sat_weight):
    t = pl.program_id(1)
    x3 = img_ref[0]                                           # (3, tp)
    gh = gh_ref[0]                                            # (nb_pad, 1), padded bins = 0
    p = _hsv_pieces(x3, sat_weight)
    hue, w = p["hue"], p["w"]

    pix = t * tp + lax.broadcasted_iota(jnp.int32, (1, tp), 1)
    valid = (pix < n_pix).astype(jnp.float32)

    m_plus, m_sub, bin_n, bin_p = _bin_masks(hue, nbins, nb_pad)

    # d loss / d hue  and  d loss / d weighting   (reduce over bins -> (1, tp))
    g_hue = w * jnp.sum(gh * (m_sub - m_plus), axis=0, keepdims=True) * valid
    g_w = jnp.sum(gh * (m_plus * (bin_n - hue) + m_sub * (hue - bin_p)),
                  axis=0, keepdims=True) * valid

    # weighting = sqrt(sat * val)
    if sat_weight:
        sv = p["sat"] * p["val"]
        inv_w = jnp.where(sv > 0.0, lax.rsqrt(jnp.where(sv > 0.0, sv, 1.0)), 0.0)
        g_sat = 0.5 * g_w * p["val"] * inv_w
        g_val = 0.5 * g_w * p["sat"] * inv_w
    else:
        g_sat = jnp.zeros_like(g_w)
        g_val = jnp.zeros_like(g_w)

    # hue = frac((off + num/d) / 6), constant 0 where d == 0
    inv_d = jnp.where(p["d"] > 0.0, 1.0 / p["d_safe"], 0.0)
    g_h6 = g_hue * (1.0 / 6.0)
    g_num = g_h6 * inv_d
    g_d = -g_h6 * p["num"] * inv_d * inv_d
    # sat = d / maxc ; val = maxc ; d = maxc - minc
    inv_max = 1.0 / p["maxc"]
    g_d = g_d + g_sat * inv_max
    g_maxc = g_val - g_sat * p["d"] * inv_max * inv_max + g_d
    g_minc = -g_d

    fr = p["is_r"].astype(jnp.float32)
    fg = p["is_g"].astype(jnp.float32)
    fb = p["is_b"].astype(jnp.float32)
    min_is_r = p["minc"] == p["r01"]
    min_is_g = jnp.logical_and(jnp.logical_not(min_is_r), p["minc"] == p["g01"])
    min_is_b = jnp.logical_not(jnp.logical_or(min_is_r, min_is_g))
    mr = min_is_r.astype(jnp.float32)
    mg = min_is_g.astype(jnp.float32)
    mb = min_is_b.astype(jnp.float32)

    # num: r-branch g-b, g-branch b-r, b-branch r-g
    g_r01 = g_num * (fb - fg) + g_maxc * fr + g_minc * mr
    g_g01 = g_num * (fr - fb) + g_maxc * fg + g_minc * mg
    g_b01 = g_num * (fg - fr) + g_maxc * fb + g_minc * mb

    # rgb01 = clip((img + 1)/2, eps, 1 - eps)
    def to_img(g01, raw):
        x01 = (raw + 1.0) * 0.5
        pass_m = ((x01 >= _EPS) & (x01 <= 1.0 - _EPS)).astype(jnp.float32)
        return 0.5 * g01 * pass_m

    out = jnp.concatenate(
        [to_img(g_r01, p["r"]), to_img(g_g01, p["g"]), to_img(g_b01, p["b"])], axis=0)
    out_ref[0] = out                                          # (3, tp) lane-dense


# -----------------------------------------------------------------------------
# pallas_call wrappers
# -----------------------------------------------------------------------------
_CPARAMS = dict(vmem_limit_bytes=48 * 1024 * 1024)


def _pallas_histogram_raw(img_flat_pad, *, nbins, nb_pad, n_pix, tp, sat_weight):
    B, _, p_pad = img_flat_pad.shape
    n_tiles = p_pad // tp
    kernel = functools.partial(_hist_kernel, nbins=nbins, nb_pad=nb_pad,
                               n_pix=n_pix, tp=tp, sat_weight=sat_weight)
    out = pl.pallas_call(
        kernel,
        out_shape=jax.ShapeDtypeStruct((B, nb_pad, 1), jnp.float32),
        grid_spec=pltpu.PrefetchScalarGridSpec(
            num_scalar_prefetch=0,
            grid=(B, n_tiles),
            in_specs=[pl.BlockSpec((1, 3, tp), lambda b, t: (b, 0, t))],
            out_specs=pl.BlockSpec((1, nb_pad, 1), lambda b, t: (b, 0, 0)),
        ),
        compiler_params=pltpu.CompilerParams(
            dimension_semantics=("parallel", "arbitrary"), **_CPARAMS),
    )(img_flat_pad)
    return out[:, :nbins, 0]                                  # [B, nbins]


def _pallas_color_grad(img_flat_pad, g_h_pad, *, nbins, nb_pad, n_pix, tp, sat_weight):
    B, _, p_pad = img_flat_pad.shape
    n_tiles = p_pad // tp
    kernel = functools.partial(_grad_kernel, nbins=nbins, nb_pad=nb_pad,
                               n_pix=n_pix, tp=tp, sat_weight=sat_weight)
    return pl.pallas_call(
        kernel,
        out_shape=jax.ShapeDtypeStruct((B, 3, p_pad), jnp.float32),
        grid_spec=pltpu.PrefetchScalarGridSpec(
            num_scalar_prefetch=0,
            grid=(B, n_tiles),
            in_specs=[pl.BlockSpec((1, 3, tp), lambda b, t: (b, 0, t)),
                      pl.BlockSpec((1, nb_pad, 1), lambda b, t: (b, 0, 0))],
            out_specs=pl.BlockSpec((1, 3, tp), lambda b, t: (b, 0, t)),
        ),
        compiler_params=pltpu.CompilerParams(
            dimension_semantics=("parallel", "parallel"), **_CPARAMS),
    )(img_flat_pad, g_h_pad)


# -----------------------------------------------------------------------------
# Module mirror
# -----------------------------------------------------------------------------
class ColorMatchGradsPallas:
    def __init__(self, scale, saturation_weighting=True, bins=255):
        self.scale = float(scale)
        self.bins = int(bins)
        self.saturation_weighting = bool(saturation_weighting)
        self.nb_pad = max(_round_up(self.bins, 8), 8)
        self.target = None

    def _prep(self, img):
        B, C, H, W = img.shape
        assert C == 3, "ColorMatchGrads expects RGB input"
        P = H * W
        tp = min(_MAX_TILE, _round_up(P, _LANE))
        p_pad = _round_up(P, tp)
        flat = img.reshape(B, 3, P).astype(jnp.float32)
        if p_pad != P:
            flat = jnp.pad(flat, ((0, 0), (0, 0), (0, p_pad - P)))
        return flat, P, tp

    def _raw_histogram(self, img):
        flat, P, tp = self._prep(img)
        return _pallas_histogram_raw(flat, nbins=self.bins, nb_pad=self.nb_pad,
                                     n_pix=P, tp=tp,
                                     sat_weight=self.saturation_weighting)

    def histogram(self, img):
        h = self._raw_histogram(img)
        return h / jnp.sum(h, axis=-1, keepdims=True)

    def set_targets(self, style_img):
        # cached once; never recomputed per forward call (perf feedback #1)
        self.target = self.histogram(style_img)

    def __call__(self, img, t=None):
        if self.target is None:
            return jnp.zeros_like(img)            # GradModule base behaviour
        flat, P, tp = self._prep(img)
        B, _, H, W = img.shape
        nbins = self.bins

        h = _pallas_histogram_raw(flat, nbins=nbins, nb_pad=self.nb_pad, n_pix=P,
                                  tp=tp, sat_weight=self.saturation_weighting)
        # tiny [B, nbins] glue: normalisation + MSE backward to the raw histogram
        S = jnp.sum(h, axis=-1, keepdims=True)
        hist = h / S
        g_hist = (2.0 * self.scale / (B * nbins)) * (hist - self.target)
        g_h = (g_hist - jnp.sum(g_hist * hist, axis=-1, keepdims=True)) / S
        g_h_pad = jnp.pad(g_h, ((0, 0), (0, self.nb_pad - nbins)))[:, :, None]

        grad_flat = _pallas_color_grad(flat, g_h_pad, nbins=nbins, nb_pad=self.nb_pad,
                                       n_pix=P, tp=tp,
                                       sat_weight=self.saturation_weighting)
        return grad_flat[:, :, :P].reshape(B, 3, H, W).astype(img.dtype)


# -----------------------------------------------------------------------------
# Pure-JAX reference (for correctness check via jax.grad)
# -----------------------------------------------------------------------------
def _ref_hue_weight(img, sat_weighting):
    x = jnp.clip((img.astype(jnp.float32) + 1.0) * 0.5, _EPS, 1.0 - _EPS)
    r, g, b = x[:, 0], x[:, 1], x[:, 2]
    maxc = jnp.maximum(jnp.maximum(r, g), b)
    minc = jnp.minimum(jnp.minimum(r, g), b)
    d = maxc - minc
    sat = d / maxc
    val = maxc
    is_r = maxc == r
    is_g = jnp.logical_and(jnp.logical_not(is_r), maxc == g)
    num = jnp.where(is_r, g - b, jnp.where(is_g, b - r, r - g))
    off = jnp.where(is_r, 0.0, jnp.where(is_g, 2.0, 4.0))
    d_safe = jnp.where(d > 0.0, d, 1.0)
    hue6 = (off + num / d_safe) * (1.0 / 6.0)
    hue = hue6 - jnp.floor(hue6)
    hue = jnp.where(d > 0.0, hue, 0.0)
    hue = jnp.clip(hue, 0.0, 1.0)
    sat = jnp.clip(sat, 0.0, 1.0)
    val = jnp.clip(val, 0.0, 1.0)
    wgt = jnp.sqrt(sat * val) if sat_weighting else jnp.ones_like(hue)
    return hue, wgt


def _ref_histogram(img, nbins, sat_weighting):
    hue, wgt = _ref_hue_weight(img, sat_weighting)
    B = img.shape[0]
    xk = hue.reshape(B, -1)[:, :, None]
    wk = wgt.reshape(B, -1)[:, :, None]
    delta = 1.0 / (nbins - 1)
    kf = jnp.arange(nbins, dtype=jnp.float32)
    bin_k = kf * delta
    bin_n = bin_k + delta
    bin_p = bin_k - delta
    m_plus = ((xk >= bin_k) & (xk < bin_n)).astype(jnp.float32)
    m_sub = ((xk >= bin_p) & (xk < bin_k) & (kf >= 1.0)).astype(jnp.float32)
    h = jnp.sum(wk * (m_plus * (bin_n - xk) + m_sub * (xk - bin_p)), axis=1)
    return h / jnp.sum(h, axis=-1, keepdims=True)


def _ref_loss(img, target, nbins, scale, sat_weighting):
    h = _ref_histogram(img, nbins, sat_weighting)
    return scale * jnp.mean((h - target) ** 2)


if __name__ == "__main__":
    key = jax.random.PRNGKey(0)
    k_img, k_sty = jax.random.split(key)

    B, C, H, W = 2, 3, 16, 16
    img = jax.random.uniform(k_img, (B, C, H, W), jnp.float32, -1.0, 1.0)
    style = jax.random.uniform(k_sty, (B, C, H, W), jnp.float32, -1.0, 1.0)

    mod = ColorMatchGradsPallas(scale=1.0, saturation_weighting=True, bins=255)

    # no-target branch -> zeros
    zero = mod(img)
    assert zero.shape == img.shape and float(jnp.max(jnp.abs(zero))) == 0.0

    # histogram itself vs reference (continuous in hue -> tight tolerance)
    hist_pal = jax.block_until_ready(mod.histogram(img))
    hist_ref = _ref_histogram(img, mod.bins, mod.saturation_weighting)
    assert float(jnp.max(jnp.abs(hist_pal - hist_ref))) < 1e-5

    # target-set branch: ColorMatch gradient via Pallas kernels
    mod.set_targets(style)
    grad = jax.block_until_ready(mod(img))
    assert grad.shape == img.shape and grad.dtype == jnp.float32

    # correctness vs autodiff of the pure-JAX reference
    target_ref = _ref_histogram(style, mod.bins, mod.saturation_weighting)
    grad_ref = jax.grad(lambda x: _ref_loss(x, target_ref, mod.bins, mod.scale,
                                            mod.saturation_weighting))(img)

    # the gradient is piecewise-constant in hue across bin edges: exclude pixels
    # whose hue sits within 1e-5 of an edge (ulp-level rounding could flip bins)
    hue_ref, _ = _ref_hue_weight(img, mod.saturation_weighting)
    delta = 1.0 / (mod.bins - 1)
    q = hue_ref / delta
    safe = (jnp.abs(q - jnp.round(q)) * delta > 1e-5)[:, None, :, :]

    err = float(jnp.max(jnp.abs(grad - grad_ref) * safe))
    ref_mag = float(jnp.max(jnp.abs(grad_ref)))
    assert err <= 1e-3 * ref_mag + 1e-9, f"mismatch: max err {err}, ref mag {ref_mag}"

    print("KERNEL_OK")
</pallas_src>

<mosaic_0001>
module attributes {stable_mosaic.version = 11 : i64} {
  func.func @_hist_kernel(%arg0: i32, %arg1: i32, %arg2: memref<1x3x256xf32, #tpu.memory_space<vmem>>, %arg3: memref<1x256x1xf32, #tpu.memory_space<vmem>>) attributes {dimension_semantics = [#tpu.dimension_semantics<parallel>, #tpu.dimension_semantics<arbitrary>], iteration_bounds = array<i64: 2, 1>, scalar_prefetch = 0 : i64, scratch_operands = 0 : i64, tpu.core_type = #tpu.core_type<tc>, window_params = [{transform_indices = @transform_0, window_bounds = array<i64: 1, 3, 256>}, {transform_indices = @transform_1, window_bounds = array<i64: 1, 256, 1>}]} {
    %c0_i32 = arith.constant 0 : i32
    %0 = arith.cmpi eq, %arg1, %c0_i32 : i32
    %1 = arith.extui %0 : i1 to i32
    %c0_i32_0 = arith.constant 0 : i32
    %2 = arith.cmpi ne, %1, %c0_i32_0 : i32
    scf.if %2 {
      %cst_34 = arith.constant 0.000000e+00 : f32
      %132 = vector.broadcast %cst_34 : f32 to vector<1x256x1xf32>
      %c0_35 = arith.constant 0 : index
      %c0_36 = arith.constant 0 : index
      %c0_37 = arith.constant 0 : index
      %133 = vector.load %arg3[%c0_35, %c0_36, %c0_37] : memref<1x256x1xf32, #tpu.memory_space<vmem>>, vector<1x256x1xf32>
      tpu.vector_store %arg3[%c0_35, %c0_36, %c0_37], %132 {strides = array<i32>} : memref<1x256x1xf32, #tpu.memory_space<vmem>>, vector<1x256x1xf32>,
    } else {
    }
    %c0 = arith.constant 0 : index
    %c0_1 = arith.constant 0 : index
    %c0_2 = arith.constant 0 : index
    %3 = vector.load %arg2[%c0, %c0_1, %c0_2] : memref<1x3x256xf32, #tpu.memory_space<vmem>>, vector<1x3x256xf32>
    %4 = vector.shape_cast %3 : vector<1x3x256xf32> to vector<3x256xf32>
    %5 = vector.extract_strided_slice %4 {offsets = [0, 0], sizes = [1, 256], strides = [1, 1]} : vector<3x256xf32> to vector<1x256xf32>
    %6 = vector.extract_strided_slice %4 {offsets = [1, 0], sizes = [1, 256], strides = [1, 1]} : vector<3x256xf32> to vector<1x256xf32>
    %7 = vector.extract_strided_slice %4 {offsets = [2, 0], sizes = [1, 256], strides = [1, 1]} : vector<3x256xf32> to vector<1x256xf32>
    %cst = arith.constant 1.000000e+00 : f32
    %8 = vector.broadcast %cst : f32 to vector<1x256xf32>
    %9 = arith.addf %5, %8 : vector<1x256xf32>
    %cst_3 = arith.constant 5.000000e-01 : f32
    %10 = vector.broadcast %cst_3 : f32 to vector<1x256xf32>
    %11 = arith.mulf %9, %10 : vector<1x256xf32>
    %cst_4 = arith.constant 9.99999993E-9 : f32
    %cst_5 = arith.constant 1.000000e+00 : f32
    %12 = vector.broadcast %cst_4 : f32 to vector<1x256xf32>
    %13 = arith.maximumf %12, %11 : vector<1x256xf32>
    %14 = vector.broadcast %cst_5 : f32 to vector<1x256xf32>
    %15 = arith.minimumf %14, %13 : vector<1x256xf32>
    %cst_6 = arith.constant 1.000000e+00 : f32
    %16 = vector.broadcast %cst_6 : f32 to vector<1x256xf32>
    %17 = arith.addf %6, %16 : vector<1x256xf32>
    %cst_7 = arith.constant 5.000000e-01 : f32
    %18 = vector.broadcast %cst_7 : f32 to vector<1x256xf32>
    %19 = arith.mulf %17, %18 : vector<1x256xf32>
    %cst_8 = arith.constant 9.99999993E-9 : f32
    %cst_9 = arith.constant 1.000000e+00 : f32
    %20 = vector.broadcast %cst_8 : f32 to vector<1x256xf32>
    %21 = arith.maximumf %20, %19 : vector<1x256xf32>
    %22 = vector.broadcast %cst_9 : f32 to vector<1x256xf32>
    %23 = arith.minimumf %22, %21 : vector<1x256xf32>
    %cst_10 = arith.constant 1.000000e+00 : f32
    %24 = vector.broadcast %cst_10 : f32 to vector<1x256xf32>
    %25 = arith.addf %7, %24 : vector<1x256xf32>
    %cst_11 = arith.constant 5.000000e-01 : f32
    %26 = vector.broadcast %cst_11 : f32 to vector<1x256xf32>
    %27 = arith.mulf %25, %26 : vector<1x256xf32>
    %cst_12 = arith.constant 9.99999993E-9 : f32
    %cst_13 = arith.constant 1.000000e+00 : f32
    %28 = vector.broadcast %cst_12 : f32 to vector<1x256xf32>
    %29 = arith.maximumf %28, %27 : vector<1x256xf32>
    %30 = vector.broadcast %cst_13 : f32 to vector<1x256xf32>
    %31 = arith.minimumf %30, %29 : vector<1x256xf32>
    %32 = arith.maximumf %15, %23 : vector<1x256xf32>
    %33 = arith.maximumf %32, %31 : vector<1x256xf32>
    %34 = arith.minimumf %15, %23 : vector<1x256xf32>
    %35 = arith.minimumf %34, %31 : vector<1x256xf32>
    %36 = arith.subf %33, %35 : vector<1x256xf32>
    %37 = arith.divf %36, %33 : vector<1x256xf32>
    %38 = arith.cmpf oeq, %33, %15 : vector<1x256xf32>
    %cst_14 = arith.constant dense<true> : vector<1x256xi1>
    %39 = arith.xori %38, %cst_14 : vector<1x256xi1>
    %40 = arith.cmpf oeq, %33, %23 : vector<1x256xf32>
    %41 = arith.andi %39, %40 : vector<1x256xi1>
    %42 = arith.subf %23, %31 : vector<1x256xf32>
    %43 = arith.subf %31, %15 : vector<1x256xf32>
    %44 = arith.subf %15, %23 : vector<1x256xf32>
    %45 = arith.select %41, %43, %44 : vector<1x256xi1>, vector<1x256xf32>
    %46 = arith.select %38, %42, %45 : vector<1x256xi1>, vector<1x256xf32>
    %cst_15 = arith.constant 2.000000e+00 : f32
    %cst_16 = arith.constant 4.000000e+00 : f32
    %47 = vector.broadcast %cst_15 : f32 to vector<1x256xf32>
    %48 = vector.broadcast %cst_16 : f32 to vector<1x256xf32>
    %49 = arith.select %41, %47, %48 : vector<1x256xi1>, vector<1x256xf32>
    %cst_17 = arith.constant 0.000000e+00 : f32
    %50 = vector.broadcast %cst_17 : f32 to vector<1x256xf32>
    %51 = arith.select %38, %50, %49 : vector<1x256xi1>, vector<1x256xf32>
    %cst_18 = arith.constant 0.000000e+00 : f32
    %52 = vector.broadcast %cst_18 : f32 to vector<1x256xf32>
    %53 = arith.cmpf ogt, %36, %52 : vector<1x256xf32>
    %cst_19 = arith.constant 1.000000e+00 : f32
    %54 = vector.broadcast %cst_19 : f32 to vector<1x256xf32>
    %55 = arith.select %53, %36, %54 : vector<1x256xi1>, vector<1x256xf32>
    %56 = arith.divf %46, %55 : vector<1x256xf32>
    %57 = arith.addf %51, %56 : vector<1x256xf32>
    %cst_20 = arith.constant 0.166666672 : f32
    %58 = vector.broadcast %cst_20 : f32 to vector<1x256xf32>
    %59 = arith.mulf %57, %58 : vector<1x256xf32>
    %60 = math.floor %59 : vector<1x256xf32>
    %61 = arith.subf %59, %60 : vector<1x256xf32>
    %cst_21 = arith.constant 0.000000e+00 : f32
    %62 = vector.broadcast %cst_21 : f32 to vector<1x256xf32>
    %63 = arith.cmpf ogt, %36, %62 : vector<1x256xf32>
    %cst_22 = arith.constant 0.000000e+00 : f32
    %64 = vector.broadcast %cst_22 : f32 to vector<1x256xf32>
    %65 = arith.select %63, %61, %64 : vector<1x256xi1>, vector<1x256xf32>
    %66 = arith.mulf %37, %33 : vector<1x256xf32>
    %67 = math.sqrt %66 : vector<1x256xf32>
    %c256_i32 = arith.constant 256 : i32
    %68 = arith.muli %arg1, %c256_i32 : i32
    %69 = tpu.iota {dimensions = array<i32: 1>} : vector<1x256xi32>
    %70 = vector.broadcast %68 : i32 to vector<1x256xi32>
    %71 = arith.addi %70, %69 : vector<1x256xi32>
    %c256_i32_23 = arith.constant 256 : i32
    %72 = vector.broadcast %c256_i32_23 : i32 to vector<1x256xi32>
    %73 = arith.cmpi slt, %71, %72 : vector<1x256xi32>
    %74 = arith.extui %73 : vector<1x256xi1> to vector<1x256xi32>
    %75 = arith.sitofp %74 : vector<1x256xi32> to vector<1x256xf32>
    %76 = arith.mulf %67, %75 : vector<1x256xf32>
    %77 = tpu.iota {dimensions = array<i32: 0>} : vector<256x1xi32>
    %78 = arith.sitofp %77 : vector<256x1xi32> to vector<256x1xf32>
    %cst_24 = arith.constant 0.00393700786 : f32
    %79 = vector.broadcast %cst_24 : f32 to vector<256x1xf32>
    %80 = arith.mulf %78, %79 : vector<256x1xf32>
    %cst_25 = arith.constant 0.00393700786 : f32
    %81 = vector.broadcast %cst_25 : f32 to vector<256x1xf32>
    %82 = arith.addf %80, %81 : vector<256x1xf32>
    %cst_26 = arith.constant 0.00393700786 : f32
    %83 = vector.broadcast %cst_26 : f32 to vector<256x1xf32>
    %84 = arith.subf %80, %83 : vector<256x1xf32>
    %c255_i32 = arith.constant 255 : i32
    %85 = vector.broadcast %c255_i32 : i32 to vector<256x1xi32>
    %86 = arith.cmpi slt, %77, %85 : vector<256x1xi32>
    %87 = vector.broadcast %65 : vector<1x256xf32> to vector<256x256xf32>
    %88 = vector.broadcast %80 : vector<256x1xf32> to vector<256x256xf32>
    %89 = arith.cmpf oge, %87, %88 : vector<256x256xf32>
    %90 = vector.broadcast %65 : vector<1x256xf32> to vector<256x256xf32>
    %91 = vector.broadcast %82 : vector<256x1xf32> to vector<256x256xf32>
    %92 = arith.cmpf olt, %90, %91 : vector<256x256xf32>
    %93 = arith.andi %89, %92 : vector<256x256xi1>
    %94 = vector.broadcast %86 : vector<256x1xi1> to vector<256x256xi1>
    %95 = arith.andi %93, %94 : vector<256x256xi1>
    %96 = arith.extui %95 : vector<256x256xi1> to vector<256x256xi32>
    %97 = arith.sitofp %96 : vector<256x256xi32> to vector<256x256xf32>
    %98 = vector.broadcast %65 : vector<1x256xf32> to vector<256x256xf32>
    %99 = vector.broadcast %84 : vector<256x1xf32> to vector<256x256xf32>
    %100 = arith.cmpf oge, %98, %99 : vector<256x256xf32>
    %101 = vector.broadcast %65 : vector<1x256xf32> to vector<256x256xf32>
    %102 = vector.broadcast %80 : vector<256x1xf32> to vector<256x256xf32>
    %103 = arith.cmpf olt, %101, %102 : vector<256x256xf32>
    %104 = arith.andi %100, %103 : vector<256x256xi1>
    %c1_i32 = arith.constant 1 : i32
    %105 = vector.broadcast %c1_i32 : i32 to vector<256x1xi32>
    %106 = arith.cmpi sge, %77, %105 : vector<256x1xi32>
    %107 = vector.broadcast %106 : vector<256x1xi1> to vector<256x256xi1>
    %108 = arith.andi %104, %107 : vector<256x256xi1>
    %109 = vector.broadcast %86 : vector<256x1xi1> to vector<256x256xi1>
    %110 = arith.andi %108, %109 : vector<256x256xi1>
    %111 = arith.extui %110 : vector<256x256xi1> to vector<256x256xi32>
    %112 = arith.sitofp %111 : vector<256x256xi32> to vector<256x256xf32>
    %113 = vector.broadcast %82 : vector<256x1xf32> to vector<256x256xf32>
    %114 = vector.broadcast %65 : vector<1x256xf32> to vector<256x256xf32>
    %115 = arith.subf %113, %114 : vector<256x256xf32>
    %116 = arith.mulf %97, %115 : vector<256x256xf32>
    %117 = vector.broadcast %65 : vector<1x256xf32> to vector<256x256xf32>
    %118 = vector.broadcast %84 : vector<256x1xf32> to vector<256x256xf32>
    %119 = arith.subf %117, %118 : vector<256x256xf32>
    %120 = arith.mulf %112, %119 : vector<256x256xf32>
    %121 = arith.addf %116, %120 : vector<256x256xf32>
    %122 = vector.broadcast %76 : vector<1x256xf32> to vector<256x256xf32>
    %123 = arith.mulf %122, %121 : vector<256x256xf32>
    %c0_27 = arith.constant 0 : index
    %c0_28 = arith.constant 0 : index
    %c0_29 = arith.constant 0 : index
    %124 = vector.load %arg3[%c0_27, %c0_28, %c0_29] : memref<1x256x1xf32, #tpu.memory_space<vmem>>, vector<1x256x1xf32>
    %125 = vector.shape_cast %124 : vector<1x256x1xf32> to vector<256x1xf32>
    %cst_30 = arith.constant dense<0.000000e+00> : vector<256xf32>
    %126 = vector.multi_reduction <add>, %123, %cst_30 [1] : vector<256x256xf32> to vector<256xf32>
    %127 = vector.shape_cast %126 : vector<256xf32> to vector<256x1xf32>
    %128 = arith.addf %125, %127 : vector<256x1xf32>
    %c0_31 = arith.constant 0 : index
    %c0_32 = arith.constant 0 : index
    %c0_33 = arith.constant 0 : index
    %129 = vector.load %arg3[%c0_31, %c0_32, %c0_33] : memref<1x256x1xf32, #tpu.memory_space<vmem>>, vector<1x256x1xf32>
    %130 = vector.shape_cast %129 : vector<1x256x1xf32> to vector<256x1xf32>
    %131 = vector.shape_cast %128 : vector<256x1xf32> to vector<1x256x1xf32>
    tpu.vector_store %arg3[%c0_31, %c0_32, %c0_33], %131 {strides = array<i32>} : memref<1x256x1xf32, #tpu.memory_space<vmem>>, vector<1x256x1xf32>,
    return
  }
  func.func @transform_0(%arg0: i32, %arg1: i32) -> (i32, i32, i32) {
    %c0_i32 = arith.constant 0 : i32
    %c0_i32_0 = arith.constant 0 : i32
    return %arg0, %c0_i32, %arg1 : i32, i32, i32
  }
  func.func @transform_1(%arg0: i32, %arg1: i32) -> (i32, i32, i32) {
    %c0_i32 = arith.constant 0 : i32
    %c0_i32_0 = arith.constant 0 : i32
    %c0_i32_1 = arith.constant 0 : i32
    return %arg0, %c0_i32, %c0_i32_0 : i32, i32, i32
  }
}

</mosaic_0001>

<bundles_post_ra>
// kernel: tpu_custom_call.1
= control target key start
LH: loop header
LB: loop body
LE: loop exit
PB: predicated region body
PF: predicated region fallthrough
CT: control target
= control target key end

     0   :  { %s2380_s6 = smov 0   ;;  %s2382_s7 = smov 0   ;;  %s3596_s0 = inlined_call_operand.vmem [shape: f32[2,3,256], index: 0, kind: input, shape index: {}]   ;;  %s3597_s1 = inlined_call_operand.vmem [shape: f32[2,256,1], index: 1, kind: output, shape index: {}]  }
   0x1   :  { %s2384_s8 = smov 0  }
   0x2 LB: > { %s23_s9 = sadd.s32 1, %s2360_s7  ;;  %p2137_p0 = scmp.ge.s32.totalorder %s2364_s8, 1  ;;  %s2364_s8 = sphi %s2384_s8, %s11_s8   ;;  %s2360_s7 = sphi %s2382_s7, %s3601_s7   ;;  %s2356_s6 = sphi %s2380_s6, %s3600_s6  }
   0x3   : > { %p25_p1 = scmp.ge.s32.totalorder %s23_s9, 2  ;;  %p106_p2 = scmp.lt.s32.totalorder %s2364_s8, 3 }
   0x5   : > { %s3603_s9 = smov (%p25_p1, %s23_s9), 0  ;;  %p107_p3 = pnand %p2137_p0, %p106_p2 }
   0x6   : > { %p131_p4 = scmp.lt.s32.totalorder (!%p107_p3), %s2356_s6, 1 }
   0x7   : > { %110 = sbr.rel (%p107_p3) target bundleno = 432 (0x1b0), region = 24 }
   0xc   : > { %s3605_s6 = smov (!%p131_p4, %s2356_s6), 1  ;;  %v288_v18 = vlaneseq  ;;  %vm2366_vm2 = vmmov 1   ;;  %v2367_v42 = vmov 4.0   ;;  %v2368_v61 = vmov 1.0  }
   0xd   : > { %s2306_s10 = sshll.u32 %s3605_s6, 3  ;;  %v283_v62 = vrot.slane %v2368_v61, 4  ;;  %vm284_vm14 = vcmask 1043456   ;;  %s2307_s14 = sshll.u32 %s3605_s6, 8 }
   0xe   : > { %s138_s13 = scalar_lea.vmem %s3596_s0, %s2306_s10  ;;  %v2415_v28 = vshrl.u32 %v288_v18, 7  ;;  %s3272_s17 = scalar_lea.vmem %s3597_s1, %s2307_s14 }
   0xf   : > { %v182_v0 = vld [vmem:[%s138_s13] sm:$0x77] }
  0x10   : > { %v183_v1 = vadd.f32 1.0, %v182_v0  ;;  %v291_v40 = vadd.s32 16, %v2415_v28  ;;  %v293_v50 = vadd.s32 32, %v2415_v28  ;;  %v292_v53 = vadd.s32 24, %v2415_v28 }
  0x11   : > { %v321_v54 = vcvt.s32.f32 %v2415_v28  ;;  %v290_v56 = vadd.s32 8, %v2415_v28 }
  0x12   : > { %v184_v2 = vmul.f32 0.5, %v183_v1  ;;  %v323_v52 = vcvt.s32.f32 %v291_v40  ;;  %v325_v57 = vcvt.s32.f32 %v293_v50  ;;  %v324_v60 = vcvt.s32.f32 %v292_v53 }
  0x13   : > { %v2432_v63 = vmul.f32 0.003937008, %v321_v54 }
  0x14   : > { %v185_v3 = vmax.f32 %v184_v2, 1e-08  ;;  %v355_v59 = vmul.f32 0.003937008, %v323_v52  ;;  %v322_v2 = vcvt.s32.f32 %v290_v56 }
  0x16   : > { %v186_v4 = vmin.f32 %v185_v3, 1.0 }
  0x18   : > { %v188_v5 = vrot.slane %v186_v4, 5  ;;  %v192_v6 = vrot.slane %v186_v4, 6 }
  0x1a   : > { %v189_v7 = vrot.slane %v188_v5, 4  ;;  %v193_v8 = vrot.slane %v192_v6, 4  ;;  %v220_v17 = vsub.f32 %v186_v4, %v192_v6  ;;  %v387_v6 = vadd.f32 0.003937008, %v355_v59 }
  0x1c   : > { %v191_v9 = vmax.f32 %v186_v4, %v189_v7  ;;  %v196_v10 = vmin.f32 %v186_v4, %v189_v7  ;;  %v218_v23 = vsub.f32 %v186_v4, %v189_v7  ;;  %v2142_v26 = vrot.slane %v220_v17, 10 }
  0x1e   : > { %v195_v11 = vmax.f32 %v191_v9, %v193_v8  ;;  %v197_v12 = vmin.f32 %v196_v10, %v193_v8  ;;  %v2143_v34 = vrot.slane %v218_v23, 9  ;;  %v2437_v8 = vmul.f32 0.003937008, %v324_v60 }
  0x1f   : > { %v285_v10 = vsel %vm284_vm14, 1.0, %v283_v62 }
  0x20   : > { %v2404_v13 = vsub.f32 %v195_v11, %v197_v12  ;;  %2336 = vrcp.f32 %v195_v11  ;;  %vm214_vm1 = vcmp.eq.f32.partialorder %v195_v11, %v186_v4  ;;  %v208_v19 = vand.u32 2147483647, %v195_v11 }
  0x21   : > { %v210_v20 = vand.u32 2147483648, %v195_v11  ;;  %vm215_vm3 = vmxor %vm214_vm1, %vm2366_vm2  ;;  %vm216_vm4 = vcmp.eq.f32.partialorder %v195_v11, %v189_v7  ;;  %vm204_vm5 = vweird.f32 %v195_v11  ;;  %v2435_v4 = vmul.f32 0.003937008, %v325_v57 }
  0x22   : > { %vm233_vm0 = vcmp.gt.f32.partialorder %v2404_v13, 0.0  ;;  %vm2411_vm7 = vmand %vm215_vm3, %vm216_vm4  ;;  %vm209_vm9 = vcmp.eq.f32.partialorder %v208_v19, 8.507059e+37  ;;  %v2146_v7 = vadd.f32 -0.003937008, %v355_v59  ;;  %v2443_v12 = vadd.f32 -0.003937008, %v2432_v63 }
  0x23   : > { %v234_v14 = vsel %vm233_vm0, %v2404_v13, 1.0  ;;  %v211_v29 = vor.u32 1.1754944e-38, %v210_v20  ;;  %v225_v36 = vsel %vm2411_vm7, %v2142_v26, %v218_v23  ;;  %v231_v43 = vsel %vm2411_vm7, 2.0, %v2367_v42 }
  0x24   : > { %2338 = vrcp.f32 %v234_v14  ;;  %vm240_vm10 = vweird.f32 %v234_v14  ;;  %v246_v30 = vand.u32 2147483648, %v234_v14  ;;  %v244_v33 = vand.u32 2147483647, %v234_v14 }
  0x25   : > { %v230_v45 = vsel %vm214_vm1, %v2143_v34, %v225_v36  ;;  %v232_v48 = vsel %vm214_vm1, 0.0, %v231_v43  ;;  %v2452_v19 = vadd.f32 0.003937008, %v2435_v4  ;;  %v2469_v26 = vadd.f32 -0.003937008, %v2437_v8 }
  0x26   : > { %v2337_v15 = vpop.eup %2336  ;;  %v247_v39 = vor.u32 1.1754944e-38, %v246_v30  ;;  %vm245_vm13 = vcmp.eq.f32.partialorder %v244_v33, 8.507059e+37  ;;  %v2369_v34 = vmov 0.0  }
  0x27   : > { %v200_v16 = vmul.f32 %v2337_v15, %v195_v11  ;;  %vm205_vm6 = vweird.f32 %v2337_v15 }
  0x28   : > { %vm206_vm8 = vmor %vm204_vm5, %vm205_vm6 }
  0x29   : > { %v201_v21 = vsub.f32 1.0, %v200_v16 }
  0x2a   : > { %v2339_v22 = vpop.eup %2338 }
  0x2b   : > { %v202_v24 = vmul.f32 %v2337_v15, %v201_v21  ;;  %v236_v27 = vmul.f32 %v2339_v22, %v234_v14  ;;  %vm241_vm11 = vweird.f32 %v2339_v22  ;;  %v2456_v21 = vadd.f32 -0.003937008, %v2435_v4 }
  0x2c   : > { %vm242_vm12 = vmor %vm240_vm10, %vm241_vm11 }
  0x2d   : > { %v203_v31 = vadd.f32 %v2337_v15, %v202_v24  ;;  %v237_v32 = vsub.f32 1.0, %v236_v27 }
  0x2f   : > { %v207_v35 = vsel %vm206_vm8, %v2337_v15, %v203_v31  ;;  %v238_v37 = vmul.f32 %v2339_v22, %v237_v32  ;;  %v2449_v15 = vmul.f32 0.003937008, %v322_v2  ;;  %v2479_v31 = vadd.s32 56, %v2415_v28 }
  0x30   : > { %v212_v38 = vsel %vm209_vm9, %v211_v29, %v207_v35  ;;  %vm1128_vm9 = vcmp.ge.s32.totalorder %v2415_v28, 1 }
  0x31   : > { %v213_v41 = vmul.f32 %v212_v38, %v2404_v13  ;;  %v239_v44 = vadd.f32 %v2339_v22, %v238_v37  ;;  %v2459_v13 = vadd.f32 0.003937008, %v2437_v8  ;;  %v2472_v27 = vadd.f32 0.003937008, %v2449_v15 }
  0x32   : > { %v2475_v29 = vadd.f32 -0.003937008, %v2449_v15 }
  0x33   : > { %v243_v46 = vsel %vm242_vm12, %v2339_v22, %v239_v44  ;;  %v2424_v47 = vmul.f32 %v213_v41, %v195_v11  ;;  %v2440_v11 = vadd.f32 0.003937008, %v2432_v63  ;;  %v2462_v22 = vadd.s32 40, %v2415_v28 }
  0x34   : > { %v248_v49 = vsel %vm245_vm13, %v247_v39, %v243_v46 }
  0x35   : > { %v249_v51 = vmul.f32 %v248_v49, %v230_v45  ;;  %2340 = vrsqrt.f32 %v2424_v47  ;;  %vm263_vm15 = vcmp.eq.f32.partialorder %v2424_v47, inf  ;;  %vm265_vm1 = vcmp.eq.f32.partialorder %v2424_v47, 0.0 }
  0x36   : > { %v266_v20 = vand.u32 2147483648, %v2424_v47  ;;  %v326_v30 = vcvt.s32.f32 %v2462_v22 }
  0x37   : > { %v250_v55 = vadd.f32 %v249_v51, %v232_v48 }
  0x39   : > { %v251_v58 = vmul.f32 0.16666667, %v250_v55 }
  0x3b   : > { %v2341_v0 = vpop.eup %2340  ;;  %v252_v1 = vfloor.f32 %v251_v58 }
  0x3c   : > { %v257_v3 = vmul.f32 %v2341_v0, %v2424_v47 }
  0x3d   : > { %v253_v5 = vsub.f32 %v251_v58, %v252_v1 }
  0x3e   : > { %v258_v9 = vmul.f32 %v2341_v0, %v257_v3 }
  0x3f   : > { %v254_v14 = vsel %vm233_vm0, %v253_v5, 0.0 }
  0x40   : > { %v259_v16 = vmul.f32 0.5, %v258_v9  ;;  %v482_v17 = vperm.slane %v254_v14, 0  ;;  %v483_v18 = vperm.slane %v254_v14, 4 }
  0x42   : > { %v260_v23 = vsub.f32 1.5, %v259_v16  ;;  %v2464_v24 = vperm.slane %v482_v17, 0  ;;  %v2466_v25 = vperm.slane %v483_v18, 0 }
  0x44   : > { %v261_v32 = vmul.f32 %v2341_v0, %v260_v23  ;;  %vm492_vm0 = vcmp.ge.f32.partialorder %v2464_v24, %v355_v59  ;;  %vm493_vm2 = vcmp.ge.f32.partialorder %v2466_v25, %v355_v59  ;;  %vm556_vm3 = vcmp.lt.f32.partialorder %v2464_v24, %v387_v6 }
  0x45   : > { %vm557_vm4 = vcmp.lt.f32.partialorder %v2466_v25, %v387_v6  ;;  %vm620_vm5 = vmand %vm492_vm0, %vm556_vm3  ;;  %vm940_vm6 = vcmp.ge.f32.partialorder %v2464_v24, %v2146_v7  ;;  %vm941_vm7 = vcmp.ge.f32.partialorder %v2466_v25, %v2146_v7  ;;  %vm1004_vm8 = vcmp.lt.f32.partialorder %v2464_v24, %v355_v59 }
  0x46   : > { %v262_v33 = vmul.f32 %v261_v32, %v2424_v47  ;;  %vm621_vm10 = vmand %vm493_vm2, %vm557_vm4  ;;  %v2180_v35 = vsel %vm620_vm5, 1.0, %v2369_v34  ;;  %vm1005_vm11 = vcmp.lt.f32.partialorder %v2466_v25, %v355_v59  ;;  %v1484_v36 = vsub.f32 %v387_v6, %v2464_v24 }
  0x47   : > { %v2181_v37 = vsel %vm621_vm10, 1.0, %v2369_v34  ;;  %vm1068_vm12 = vmand %vm940_vm6, %vm1004_vm8  ;;  %v1485_v38 = vsub.f32 %v387_v6, %v2466_v25  ;;  %v1612_v39 = vsub.f32 %v2464_v24, %v2146_v7  ;;  %v1613_v40 = vsub.f32 %v2466_v25, %v2146_v7 }
  0x48   : > { %v264_v41 = vsel %vm263_vm15, %v2424_v47, %v262_v33  ;;  %vm1069_vm13 = vmand %vm941_vm7, %vm1005_vm11  ;;  %v2244_v42 = vsel %vm1068_vm12, 1.0, %v2369_v34  ;;  %v1548_v43 = vmul.f32 %v2180_v35, %v1484_v36  ;;  %vm488_vm14 = vcmp.ge.f32.partialorder %v2464_v24, %v2432_v63 }
  0x49   : > { %v267_v44 = vsel %vm265_vm1, %v266_v20, %v264_v41  ;;  %v2245_v45 = vsel %vm1069_vm13, 1.0, %v2369_v34  ;;  %v1549_v46 = vmul.f32 %v2181_v37, %v1485_v38  ;;  %v1676_v48 = vmul.f32 %v2244_v42, %v1612_v39 }
  0x4a   : > { %v287_v49 = vmul.f32 %v285_v10, %v267_v44  ;;  %v1677_v50 = vmul.f32 %v2245_v45, %v1613_v40  ;;  %vm489_vm15 = vcmp.ge.f32.partialorder %v2466_v25, %v2432_v63  ;;  %vm552_vm0 = vcmp.lt.f32.partialorder %v2464_v24, %v2440_v11 }
  0x4b   : > { %v1740_v51 = vadd.f32 %v1676_v48, %v1548_v43  ;;  %vm553_vm2 = vcmp.lt.f32.partialorder %v2466_v25, %v2440_v11  ;;  %vm616_vm3 = vmand %vm488_vm14, %vm552_vm0  ;;  %vm936_vm1 = vcmp.ge.f32.partialorder %v2464_v24, %v2443_v12  ;;  %vm937_vm4 = vcmp.ge.f32.partialorder %v2466_v25, %v2443_v12 }
  0x4c   : > { %v1741_v47 = vadd.f32 %v1677_v50, %v1549_v46  ;;  %v1801_v52 = vperm.slane %v287_v49, 0  ;;  %v1802_v53 = vperm.slane %v287_v49, 4  ;;  %vm617_vm5 = vmand %vm489_vm15, %vm553_vm2  ;;  %v2176_v54 = vsel %vm616_vm3, 1.0, %v2369_v34 }
  0x4d   : > { %v2177_v55 = vsel %vm617_vm5, 1.0, %v2369_v34  ;;  %vm1000_vm6 = vcmp.lt.f32.partialorder %v2464_v24, %v2432_v63  ;;  %vm1001_vm7 = vcmp.lt.f32.partialorder %v2466_v25, %v2432_v63  ;;  %v1480_v56 = vsub.f32 %v2440_v11, %v2464_v24 }
  0x4e   : > { %v2526_v57 = vperm.slane %v1801_v52, 0  ;;  %v2528_v58 = vperm.slane %v1802_v53, 0  ;;  %vm1064_vm8 = vmand %vm936_vm1, %vm1000_vm6  ;;  %v1481_v59 = vsub.f32 %v2440_v11, %v2466_v25  ;;  %v1608_v60 = vsub.f32 %v2464_v24, %v2443_v12 }
  0x4f   : > { %vm1065_vm10 = vmand %vm937_vm4, %vm1001_vm7  ;;  %v1544_v61 = vmul.f32 %v2176_v54, %v1480_v56  ;;  %v1609_v62 = vsub.f32 %v2466_v25, %v2443_v12  ;;  %vm496_vm11 = vcmp.ge.f32.partialorder %v2464_v24, %v2435_v4  ;;  %vm497_vm12 = vcmp.ge.f32.partialorder %v2466_v25, %v2435_v4 }
  0x50   : > { %v1811_v63 = vmul.f32 %v2526_v57, %v1740_v51  ;;  %v1812_v0 = vmul.f32 %v2528_v58, %v1741_v47  ;;  %vm1224_vm13 = vmand %vm1064_vm8, %vm1128_vm9  ;;  %v1545_v1 = vmul.f32 %v2177_v55, %v1481_v59  ;;  %vm560_vm14 = vcmp.lt.f32.partialorder %v2464_v24, %v2452_v19 }
  0x51   : > { %vm1225_vm15 = vmand %vm1065_vm10, %vm1128_vm9  ;;  %v2240_v2 = vsel %vm1224_vm13, 1.0, %v2369_v34  ;;  %vm561_vm0 = vcmp.lt.f32.partialorder %v2466_v25, %v2452_v19  ;;  %vm944_vm2 = vcmp.ge.f32.partialorder %v2464_v24, %v2456_v21  ;;  %vm945_vm3 = vcmp.ge.f32.partialorder %v2466_v25, %v2456_v21 }
  0x52   : > { %v1909_v3 = vadd.f32 %v1812_v0, %v1811_v63  ;;  %v2241_v5 = vsel %vm1225_vm15, 1.0, %v2369_v34  ;;  %v1672_v6 = vmul.f32 %v2240_v2, %v1608_v60  ;;  %vm624_vm1 = vmand %vm496_vm11, %vm560_vm14  ;;  %vm1008_vm9 = vcmp.lt.f32.partialorder %v2464_v24, %v2435_v4 }
  0x53   : > { %v1673_v7 = vmul.f32 %v2241_v5, %v1609_v62  ;;  %vm625_vm4 = vmand %vm497_vm12, %vm561_vm0  ;;  %v2184_v9 = vsel %vm624_vm1, 1.0, %v2369_v34  ;;  %vm1009_vm5 = vcmp.lt.f32.partialorder %v2466_v25, %v2435_v4  ;;  %v1488_v10 = vsub.f32 %v2452_v19, %v2464_v24 }
  0x54   : > { %1910 = vadd.xlane.f32.xlu1 %v1909_v3  ;;  %v1736_v11 = vadd.f32 %v1672_v6, %v1544_v61  ;;  %v2185_v12 = vsel %vm625_vm4, 1.0, %v2369_v34  ;;  %vm1072_vm6 = vmand %vm944_vm2, %vm1008_vm9  ;;  %v1489_v14 = vsub.f32 %v2452_v19, %v2466_v25  ;;  %v1616_v16 = vsub.f32 %v2464_v24, %v2456_v21 }
  0x55   : > { %v1737_v17 = vadd.f32 %v1673_v7, %v1545_v1  ;;  %vm1073_vm7 = vmand %vm945_vm3, %vm1009_vm5  ;;  %v2248_v4 = vsel %vm1072_vm6, 1.0, %v2369_v34  ;;  %v1552_v18 = vmul.f32 %v2184_v9, %v1488_v10  ;;  %v1617_v20 = vsub.f32 %v2466_v25, %v2456_v21 }
  0x56   : > { %v1807_v23 = vmul.f32 %v2526_v57, %v1736_v11  ;;  %v2249_v32 = vsel %vm1073_vm7, 1.0, %v2369_v34  ;;  %v1553_v33 = vmul.f32 %v2185_v12, %v1489_v14  ;;  %v1680_v19 = vmul.f32 %v2248_v4, %v1616_v16 }
  0x57   : > { %v1808_v35 = vmul.f32 %v2528_v58, %v1737_v17  ;;  %v1681_v36 = vmul.f32 %v2249_v32, %v1617_v20  ;;  %vm494_vm8 = vcmp.ge.f32.partialorder %v2464_v24, %v2437_v8  ;;  %vm495_vm10 = vcmp.ge.f32.partialorder %v2466_v25, %v2437_v8 }
  0x58   : > { %v1744_v37 = vadd.f32 %v1680_v19, %v1552_v18  ;;  %vm558_vm11 = vcmp.lt.f32.partialorder %v2464_v24, %v2459_v13  ;;  %vm559_vm12 = vcmp.lt.f32.partialorder %v2466_v25, %v2459_v13  ;;  %vm942_vm13 = vcmp.ge.f32.partialorder %v2464_v24, %v2469_v26 }
  0x59   : > { %v1903_v21 = vadd.f32 %v1808_v35, %v1807_v23  ;;  %v1745_v38 = vadd.f32 %v1681_v36, %v1553_v33  ;;  %vm622_vm14 = vmand %vm494_vm8, %vm558_vm11  ;;  %vm943_vm15 = vcmp.ge.f32.partialorder %v2466_v25, %v2469_v26  ;;  %vm1006_vm0 = vcmp.lt.f32.partialorder %v2464_v24, %v2437_v8 }
  0x5a   : > { %v1815_v39 = vmul.f32 %v2526_v57, %v1744_v37  ;;  %vm623_vm2 = vmand %vm495_vm10, %vm559_vm12  ;;  %v2182_v40 = vsel %vm622_vm14, 1.0, %v2369_v34  ;;  %vm1007_vm3 = vcmp.lt.f32.partialorder %v2466_v25, %v2437_v8  ;;  %v1486_v41 = vsub.f32 %v2459_v13, %v2464_v24 }
  0x5b   : > { %1904 = vadd.xlane.f32.xlu0 %v1903_v21  ;;  %v1816_v42 = vmul.f32 %v2528_v58, %v1745_v38  ;;  %v2183_v43 = vsel %vm623_vm2, 1.0, %v2369_v34  ;;  %vm1070_vm1 = vmand %vm942_vm13, %vm1006_vm0  ;;  %v1487_v44 = vsub.f32 %v2459_v13, %v2466_v25  ;;  %v1614_v45 = vsub.f32 %v2464_v24, %v2469_v26 }
  0x5c   : > { %vm1071_vm9 = vmand %vm943_vm15, %vm1007_vm3  ;;  %v2246_v46 = vsel %vm1070_vm1, 1.0, %v2369_v34  ;;  %v1550_v48 = vmul.f32 %v2182_v40, %v1486_v41  ;;  %v1615_v8 = vsub.f32 %v2466_v25, %v2469_v26  ;;  %vm490_vm4 = vcmp.ge.f32.partialorder %v2464_v24, %v2449_v15 }
  0x5d   : > { %v1915_v49 = vadd.f32 %v1816_v42, %v1815_v39  ;;  %v2247_v50 = vsel %vm1071_vm9, 1.0, %v2369_v34  ;;  %v1551_v51 = vmul.f32 %v2183_v43, %v1487_v44  ;;  %v1678_v47 = vmul.f32 %v2246_v46, %v1614_v45 }
  0x5e   : > { %v1679_v52 = vmul.f32 %v2247_v50, %v1615_v8  ;;  %vm491_vm5 = vcmp.ge.f32.partialorder %v2466_v25, %v2449_v15  ;;  %vm554_vm6 = vcmp.lt.f32.partialorder %v2464_v24, %v2472_v27  ;;  %vm555_vm7 = vcmp.lt.f32.partialorder %v2466_v25, %v2472_v27 }
  0x5f   : > { %1916 = vadd.xlane.f32.xlu2 %v1915_v49  ;;  %v1742_v13 = vadd.f32 %v1678_v47, %v1550_v48  ;;  %vm618_vm8 = vmand %vm490_vm4, %vm554_vm6  ;;  %vm938_vm10 = vcmp.ge.f32.partialorder %v2464_v24, %v2475_v29  ;;  %vm939_vm11 = vcmp.ge.f32.partialorder %v2466_v25, %v2475_v29  ;;  %vm1002_vm12 = vcmp.lt.f32.partialorder %v2464_v24, %v2449_v15 }
  0x60   : > { %v1743_v26 = vadd.f32 %v1679_v52, %v1551_v51  ;;  %vm619_vm13 = vmand %vm491_vm5, %vm555_vm7  ;;  %v2178_v53 = vsel %vm618_vm8, 1.0, %v2369_v34  ;;  %vm1003_vm14 = vcmp.lt.f32.partialorder %v2466_v25, %v2449_v15  ;;  %v1482_v54 = vsub.f32 %v2472_v27, %v2464_v24 }
  0x61   : > { %v1813_v55 = vmul.f32 %v2526_v57, %v1742_v13  ;;  %v2179_v56 = vsel %vm619_vm13, 1.0, %v2369_v34  ;;  %vm1066_vm15 = vmand %vm938_vm10, %vm1002_vm12  ;;  %v1483_v59 = vsub.f32 %v2472_v27, %v2466_v25  ;;  %v1610_v60 = vsub.f32 %v2464_v24, %v2475_v29 }
  0x62   : > { %v1814_v61 = vmul.f32 %v2528_v58, %v1743_v26  ;;  %vm1067_vm0 = vmand %vm939_vm11, %vm1003_vm14  ;;  %v2242_v62 = vsel %vm1066_vm15, 1.0, %v2369_v34  ;;  %v1546_v15 = vmul.f32 %v2178_v53, %v1482_v54  ;;  %v1611_v63 = vsub.f32 %v2466_v25, %v2475_v29 }
  0x63   : > { %v2243_v0 = vsel %vm1067_vm0, 1.0, %v2369_v34  ;;  %v1547_v1 = vmul.f32 %v2179_v56, %v1483_v59  ;;  %v1674_v2 = vmul.f32 %v2242_v62, %v1610_v60  ;;  %v358_v3 = vmul.f32 0.003937008, %v326_v30 }
  0x64   : > { %v1912_v27 = vadd.f32 %v1814_v61, %v1813_v55  ;;  %v1675_v5 = vmul.f32 %v2243_v0, %v1611_v63  ;;  %v328_v6 = vcvt.s32.f32 %v2479_v31  ;;  %v2653_v7 = vadd.s32 48, %v2415_v28 }
  0x65   : > { %v1738_v9 = vadd.f32 %v1674_v2, %v1546_v15  ;;  %v390_v10 = vadd.f32 0.003937008, %v358_v3  ;;  %v2149_v11 = vadd.f32 -0.003937008, %v358_v3  ;;  %vm498_vm2 = vcmp.ge.f32.partialorder %v2464_v24, %v358_v3 }
  0x66   : > { %1913 = vadd.xlane.f32.xlu1 %v1912_v27  ;;  %v1739_v29 = vadd.f32 %v1675_v5, %v1547_v1  ;;  %vm499_vm3 = vcmp.ge.f32.partialorder %v2466_v25, %v358_v3  ;;  %vm1010_vm1 = vcmp.lt.f32.partialorder %v2464_v24, %v358_v3  ;;  %vm1011_vm9 = vcmp.lt.f32.partialorder %v2466_v25, %v358_v3 }
  0x67   : > { %v1809_v22 = vmul.f32 %v2526_v57, %v1738_v9  ;;  %vm562_vm4 = vcmp.lt.f32.partialorder %v2464_v24, %v390_v10  ;;  %vm563_vm5 = vcmp.lt.f32.partialorder %v2466_v25, %v390_v10  ;;  %vm946_vm6 = vcmp.ge.f32.partialorder %v2464_v24, %v2149_v11 }
  0x68   : > { %v1810_v30 = vmul.f32 %v2528_v58, %v1739_v29  ;;  %vm626_vm7 = vmand %vm498_vm2, %vm562_vm4  ;;  %vm947_vm8 = vcmp.ge.f32.partialorder %v2466_v25, %v2149_v11  ;;  %v1490_v31 = vsub.f32 %v390_v10, %v2464_v24  ;;  %v1491_v12 = vsub.f32 %v390_v10, %v2466_v25 }
  0x69   : > { %vm627_vm10 = vmand %vm499_vm3, %vm563_vm5  ;;  %v2186_v14 = vsel %vm626_vm7, 1.0, %v2369_v34  ;;  %v1618_v16 = vsub.f32 %v2464_v24, %v2149_v11  ;;  %v1619_v17 = vsub.f32 %v2466_v25, %v2149_v11  ;;  %v360_v4 = vmul.f32 0.003937008, %v328_v6 }
  0x6a   : > { %v1906_v18 = vadd.f32 %v1810_v30, %v1809_v22  ;;  %v2187_v20 = vsel %vm627_vm10, 1.0, %v2369_v34  ;;  %vm1074_vm11 = vmand %vm946_vm6, %vm1010_vm1  ;;  %v1554_v23 = vmul.f32 %v2186_v14, %v1490_v31  ;;  %v327_v32 = vcvt.s32.f32 %v2653_v7 }
  0x6b   : > { %vm1075_vm12 = vmand %vm947_vm8, %vm1011_vm9  ;;  %v2250_v33 = vsel %vm1074_vm11, 1.0, %v2369_v34  ;;  %v1555_v19 = vmul.f32 %v2187_v20, %v1491_v12  ;;  %v392_v35 = vadd.f32 0.003937008, %v360_v4  ;;  %v2151_v36 = vadd.f32 -0.003937008, %v360_v4 }
  0x6c   : > { %1907 = vadd.xlane.f32.xlu0 %v1906_v18  ;;  %v2251_v37 = vsel %vm1075_vm12, 1.0, %v2369_v34  ;;  %v1682_v21 = vmul.f32 %v2250_v33, %v1618_v16  ;;  %vm502_vm13 = vcmp.ge.f32.partialorder %v2464_v24, %v360_v4  ;;  %vm503_vm14 = vcmp.ge.f32.partialorder %v2466_v25, %v360_v4 }
  0x6d   : > { %v1683_v38 = vmul.f32 %v2251_v37, %v1619_v17  ;;  %vm566_vm15 = vcmp.lt.f32.partialorder %v2464_v24, %v392_v35  ;;  %vm567_vm0 = vcmp.lt.f32.partialorder %v2466_v25, %v392_v35  ;;  %vm950_vm2 = vcmp.ge.f32.partialorder %v2464_v24, %v2151_v36 }
  0x6e   : > { %v1746_v39 = vadd.f32 %v1682_v21, %v1554_v23  ;;  %vm630_vm3 = vmand %vm502_vm13, %vm566_vm15  ;;  %vm951_vm1 = vcmp.ge.f32.partialorder %v2466_v25, %v2151_v36  ;;  %vm1014_vm9 = vcmp.lt.f32.partialorder %v2464_v24, %v360_v4  ;;  %vm1015_vm4 = vcmp.lt.f32.partialorder %v2466_v25, %v360_v4 }
  0x6f   : > { %v1747_v40 = vadd.f32 %v1683_v38, %v1555_v19  ;;  %vm631_vm5 = vmand %vm503_vm14, %vm567_vm0  ;;  %v2190_v41 = vsel %vm630_vm3, 1.0, %v2369_v34  ;;  %v1494_v42 = vsub.f32 %v392_v35, %v2464_v24  ;;  %v1495_v43 = vsub.f32 %v392_v35, %v2466_v25 }
  0x70   : > { %v1817_v44 = vmul.f32 %v2526_v57, %v1746_v39  ;;  %v2191_v45 = vsel %vm631_vm5, 1.0, %v2369_v34  ;;  %vm1078_vm6 = vmand %vm950_vm2, %vm1014_vm9  ;;  %v1622_v46 = vsub.f32 %v2464_v24, %v2151_v36  ;;  %v1623_v48 = vsub.f32 %v2466_v25, %v2151_v36 }
  0x71   : > { %v1818_v8 = vmul.f32 %v2528_v58, %v1747_v40  ;;  %vm1079_vm7 = vmand %vm951_vm1, %vm1015_vm4  ;;  %v2254_v49 = vsel %vm1078_vm6, 1.0, %v2369_v34  ;;  %v1558_v50 = vmul.f32 %v2190_v41, %v1494_v42  ;;  %v1559_v51 = vmul.f32 %v2191_v45, %v1495_v43 }
  0x72   : > { %v2255_v47 = vsel %vm1079_vm7, 1.0, %v2369_v34  ;;  %v1686_v52 = vmul.f32 %v2254_v49, %v1622_v46  ;;  %v359_v13 = vmul.f32 0.003937008, %v327_v32  ;;  %v297_v26 = vadd.s32 64, %v2415_v28 }
  0x73   : > { %v1918_v53 = vadd.f32 %v1818_v8, %v1817_v44  ;;  %v1687_v54 = vmul.f32 %v2255_v47, %v1623_v48  ;;  %v299_v55 = vadd.s32 80, %v2415_v28  ;;  %v2699_v56 = vadd.s32 72, %v2415_v28 }
  0x74   : > { %v1750_v59 = vadd.f32 %v1686_v52, %v1558_v50  ;;  %v391_v60 = vadd.f32 0.003937008, %v359_v13  ;;  %v2150_v61 = vadd.f32 -0.003937008, %v359_v13  ;;  %vm500_vm8 = vcmp.ge.f32.partialorder %v2464_v24, %v359_v13 }
  0x75   : > { %1919 = vadd.xlane.f32.xlu2 %v1918_v53  ;;  %v1751_v62 = vadd.f32 %v1687_v54, %v1559_v51  ;;  %vm501_vm10 = vcmp.ge.f32.partialorder %v2466_v25, %v359_v13  ;;  %vm1012_vm11 = vcmp.lt.f32.partialorder %v2464_v24, %v359_v13  ;;  %vm1013_vm12 = vcmp.lt.f32.partialorder %v2466_v25, %v359_v13 }
  0x76   : > { %v1821_v15 = vmul.f32 %v2526_v57, %v1750_v59  ;;  %vm564_vm13 = vcmp.lt.f32.partialorder %v2464_v24, %v391_v60  ;;  %vm565_vm14 = vcmp.lt.f32.partialorder %v2466_v25, %v391_v60  ;;  %vm948_vm15 = vcmp.ge.f32.partialorder %v2464_v24, %v2150_v61 }
  0x77   : > { %v1822_v63 = vmul.f32 %v2528_v58, %v1751_v62  ;;  %vm628_vm0 = vmand %vm500_vm8, %vm564_vm13  ;;  %vm949_vm2 = vcmp.ge.f32.partialorder %v2466_v25, %v2150_v61  ;;  %v1492_v0 = vsub.f32 %v391_v60, %v2464_v24  ;;  %v1493_v1 = vsub.f32 %v391_v60, %v2466_v25 }
  0x78   : > { %vm629_vm3 = vmand %vm501_vm10, %vm565_vm14  ;;  %v2188_v2 = vsel %vm628_vm0, 1.0, %v2369_v34  ;;  %v1620_v3 = vsub.f32 %v2464_v24, %v2150_v61  ;;  %v1621_v27 = vsub.f32 %v2466_v25, %v2150_v61  ;;  %v329_v5 = vcvt.s32.f32 %v297_v26 }
  0x79   : > { %v1924_v6 = vadd.f32 %v1822_v63, %v1821_v15  ;;  %v2189_v7 = vsel %vm629_vm3, 1.0, %v2369_v34  ;;  %vm1076_vm1 = vmand %vm948_vm15, %vm1012_vm11  ;;  %v1556_v9 = vmul.f32 %v2188_v2, %v1492_v0  ;;  %v331_v10 = vcvt.s32.f32 %v299_v55 }
  0x7a   : > { %vm1077_vm9 = vmand %vm949_vm2, %vm1013_vm12  ;;  %v2252_v11 = vsel %vm1076_vm1, 1.0, %v2369_v34  ;;  %v1557_v29 = vmul.f32 %v2189_v7, %v1493_v1  ;;  %v361_v22 = vmul.f32 0.003937008, %v329_v5  ;;  %v330_v30 = vcvt.s32.f32 %v2699_v56 }
  0x7b   : > { %1925 = vadd.xlane.f32.xlu1 %v1924_v6  ;;  %v2253_v31 = vsel %vm1077_vm9, 1.0, %v2369_v34  ;;  %v1684_v12 = vmul.f32 %v2252_v11, %v1620_v3  ;;  %v363_v14 = vmul.f32 0.003937008, %v331_v10  ;;  %v2725_v16 = vadd.s32 88, %v2415_v28 }
  0x7c   : > { %v1685_v17 = vmul.f32 %v2253_v31, %v1621_v27  ;;  %v393_v4 = vadd.f32 0.003937008, %v361_v22  ;;  %v2152_v18 = vadd.f32 -0.003937008, %v361_v22  ;;  %vm504_vm4 = vcmp.ge.f32.partialorder %v2464_v24, %v361_v22 }
  0x7d   : > { %v1748_v20 = vadd.f32 %v1684_v12, %v1556_v9  ;;  %vm505_vm5 = vcmp.ge.f32.partialorder %v2466_v25, %v361_v22  ;;  %vm1016_vm6 = vcmp.lt.f32.partialorder %v2464_v24, %v361_v22  ;;  %vm1017_vm7 = vcmp.lt.f32.partialorder %v2466_v25, %v361_v22 }
  0x7e   : > { %v1749_v23 = vadd.f32 %v1685_v17, %v1557_v29  ;;  %vm568_vm8 = vcmp.lt.f32.partialorder %v2464_v24, %v393_v4  ;;  %vm569_vm10 = vcmp.lt.f32.partialorder %v2466_v25, %v393_v4  ;;  %vm952_vm11 = vcmp.ge.f32.partialorder %v2464_v24, %v2152_v18 }
  0x7f   : > { %v1819_v32 = vmul.f32 %v2526_v57, %v1748_v20  ;;  %vm632_vm12 = vmand %vm504_vm4, %vm568_vm8  ;;  %vm953_vm13 = vcmp.ge.f32.partialorder %v2466_v25, %v2152_v18  ;;  %v1496_v33 = vsub.f32 %v393_v4, %v2464_v24  ;;  %v1497_v19 = vsub.f32 %v393_v4, %v2466_v25 }
  0x80   : > { %v1820_v35 = vmul.f32 %v2528_v58, %v1749_v23  ;;  %vm633_vm14 = vmand %vm505_vm5, %vm569_vm10  ;;  %v2192_v36 = vsel %vm632_vm12, 1.0, %v2369_v34  ;;  %v1624_v37 = vsub.f32 %v2464_v24, %v2152_v18  ;;  %v1625_v21 = vsub.f32 %v2466_v25, %v2152_v18 }
  0x81   : > { %v2193_v38 = vsel %vm633_vm14, 1.0, %v2369_v34  ;;  %vm1080_vm15 = vmand %vm952_vm11, %vm1016_vm6  ;;  %v1560_v39 = vmul.f32 %v2192_v36, %v1496_v33  ;;  %v395_v40 = vadd.f32 0.003937008, %v363_v14  ;;  %v2154_v41 = vadd.f32 -0.003937008, %v363_v14 }
  0x82   : > { %v1921_v42 = vadd.f32 %v1820_v35, %v1819_v32  ;;  %vm1081_vm0 = vmand %vm953_vm13, %vm1017_vm7  ;;  %v2256_v43 = vsel %vm1080_vm15, 1.0, %v2369_v34  ;;  %v1561_v44 = vmul.f32 %v2193_v38, %v1497_v19  ;;  %vm508_vm2 = vcmp.ge.f32.partialorder %v2464_v24, %v363_v14 }
  0x83   : > { %v2257_v45 = vsel %vm1081_vm0, 1.0, %v2369_v34  ;;  %v1688_v46 = vmul.f32 %v2256_v43, %v1624_v37  ;;  %vm509_vm3 = vcmp.ge.f32.partialorder %v2466_v25, %v363_v14  ;;  %vm572_vm1 = vcmp.lt.f32.partialorder %v2464_v24, %v395_v40 }
  0x84   : > { %1922 = vadd.xlane.f32.xlu0 %v1921_v42  ;;  %v1689_v48 = vmul.f32 %v2257_v45, %v1625_v21  ;;  %vm573_vm9 = vcmp.lt.f32.partialorder %v2466_v25, %v395_v40  ;;  %vm636_vm4 = vmand %vm508_vm2, %vm572_vm1  ;;  %vm956_vm5 = vcmp.ge.f32.partialorder %v2464_v24, %v2154_v41  ;;  %vm957_vm6 = vcmp.ge.f32.partialorder %v2466_v25, %v2154_v41 }
  0x85   : > { %v1752_v8 = vadd.f32 %v1688_v46, %v1560_v39  ;;  %vm637_vm7 = vmand %vm509_vm3, %vm573_vm9  ;;  %v2196_v49 = vsel %vm636_vm4, 1.0, %v2369_v34  ;;  %vm1020_vm8 = vcmp.lt.f32.partialorder %v2464_v24, %v363_v14  ;;  %vm1021_vm10 = vcmp.lt.f32.partialorder %v2466_v25, %v363_v14 }
  0x86   : > { %v1753_v50 = vadd.f32 %v1689_v48, %v1561_v44  ;;  %v2197_v51 = vsel %vm637_vm7, 1.0, %v2369_v34  ;;  %vm1084_vm11 = vmand %vm956_vm5, %vm1020_vm8  ;;  %v1500_v47 = vsub.f32 %v395_v40, %v2464_v24  ;;  %v1501_v52 = vsub.f32 %v395_v40, %v2466_v25 }
  0x87   : > { %v1823_v13 = vmul.f32 %v2526_v57, %v1752_v8  ;;  %vm1085_vm12 = vmand %vm957_vm6, %vm1021_vm10  ;;  %v2260_v26 = vsel %vm1084_vm11, 1.0, %v2369_v34  ;;  %v1628_v53 = vsub.f32 %v2464_v24, %v2154_v41  ;;  %v1629_v54 = vsub.f32 %v2466_v25, %v2154_v41 }
  0x88   : > { %v1824_v55 = vmul.f32 %v2528_v58, %v1753_v50  ;;  %v2261_v59 = vsel %vm1085_vm12, 1.0, %v2369_v34  ;;  %v1564_v60 = vmul.f32 %v2196_v49, %v1500_v47  ;;  %v1565_v61 = vmul.f32 %v2197_v51, %v1501_v52 }
  0x89   : > { %v1692_v62 = vmul.f32 %v2260_v26, %v1628_v53  ;;  %v1693_v15 = vmul.f32 %v2261_v59, %v1629_v54  ;;  %v362_v63 = vmul.f32 0.003937008, %v330_v30  ;;  %v332_v0 = vcvt.s32.f32 %v2725_v16 }
  0x8a   : > { %v1927_v1 = vadd.f32 %v1824_v55, %v1823_v13  ;;  %v2771_v2 = vadd.s32 104, %v2415_v28  ;;  %v2774_v3 = vadd.s32 96, %v2415_v28  ;;  %v2777_v27 = vadd.s32 112, %v2415_v28 }
  0x8b   : > { %v1756_v5 = vadd.f32 %v1692_v62, %v1564_v60  ;;  %v1757_v6 = vadd.f32 %v1693_v15, %v1565_v61  ;;  %v394_v7 = vadd.f32 0.003937008, %v362_v63  ;;  %v2153_v9 = vadd.f32 -0.003937008, %v362_v63 }
  0x8c   : > { %1928 = vadd.xlane.f32.xlu2 %v1927_v1  ;;  %vm506_vm13 = vcmp.ge.f32.partialorder %v2464_v24, %v362_v63  ;;  %vm507_vm14 = vcmp.ge.f32.partialorder %v2466_v25, %v362_v63  ;;  %vm1018_vm15 = vcmp.lt.f32.partialorder %v2464_v24, %v362_v63  ;;  %vm1019_vm0 = vcmp.lt.f32.partialorder %v2466_v25, %v362_v63 }
  0x8d   : > { %v1827_v56 = vmul.f32 %v2526_v57, %v1756_v5  ;;  %v1828_v10 = vmul.f32 %v2528_v58, %v1757_v6  ;;  %vm570_vm2 = vcmp.lt.f32.partialorder %v2464_v24, %v394_v7  ;;  %vm571_vm3 = vcmp.lt.f32.partialorder %v2466_v25, %v394_v7 }
  0x8e   : > { %vm634_vm1 = vmand %vm506_vm13, %vm570_vm2  ;;  %vm954_vm9 = vcmp.ge.f32.partialorder %v2464_v24, %v2153_v9  ;;  %vm955_vm4 = vcmp.ge.f32.partialorder %v2466_v25, %v2153_v9  ;;  %v1498_v11 = vsub.f32 %v394_v7, %v2464_v24  ;;  %v1499_v29 = vsub.f32 %v394_v7, %v2466_v25 }
  0x8f   : > { %v1933_v22 = vadd.f32 %v1828_v10, %v1827_v56  ;;  %vm635_vm5 = vmand %vm507_vm14, %vm571_vm3  ;;  %v2194_v30 = vsel %vm634_vm1, 1.0, %v2369_v34  ;;  %v1626_v31 = vsub.f32 %v2464_v24, %v2153_v9  ;;  %v1627_v12 = vsub.f32 %v2466_v25, %v2153_v9 }
  0x90   : > { %v2195_v14 = vsel %vm635_vm5, 1.0, %v2369_v34  ;;  %vm1082_vm6 = vmand %vm954_vm9, %vm1018_vm15  ;;  %v1562_v16 = vmul.f32 %v2194_v30, %v1498_v11  ;;  %v364_v17 = vmul.f32 0.003937008, %v332_v0  ;;  %v334_v4 = vcvt.s32.f32 %v2771_v2 }
  0x91   : > { %1934 = vadd.xlane.f32.xlu1 %v1933_v22  ;;  %vm1083_vm7 = vmand %vm955_vm4, %vm1019_vm0  ;;  %v2258_v18 = vsel %vm1082_vm6, 1.0, %v2369_v34  ;;  %v1563_v20 = vmul.f32 %v2195_v14, %v1499_v29  ;;  %v333_v23 = vcvt.s32.f32 %v2774_v3  ;;  %v335_v32 = vcvt.s32.f32 %v2777_v27 }
  0x92   : > { %v2259_v33 = vsel %vm1083_vm7, 1.0, %v2369_v34  ;;  %v1690_v19 = vmul.f32 %v2258_v18, %v1626_v31  ;;  %v396_v35 = vadd.f32 0.003937008, %v364_v17  ;;  %v2155_v36 = vadd.f32 -0.003937008, %v364_v17 }
  0x93   : > { %v1691_v37 = vmul.f32 %v2259_v33, %v1627_v12  ;;  %vm510_vm8 = vcmp.ge.f32.partialorder %v2464_v24, %v364_v17  ;;  %vm511_vm10 = vcmp.ge.f32.partialorder %v2466_v25, %v364_v17  ;;  %vm1022_vm11 = vcmp.lt.f32.partialorder %v2464_v24, %v364_v17 }
  0x94   : > { %v1754_v21 = vadd.f32 %v1690_v19, %v1562_v16  ;;  %vm574_vm12 = vcmp.lt.f32.partialorder %v2464_v24, %v396_v35  ;;  %vm575_vm13 = vcmp.lt.f32.partialorder %v2466_v25, %v396_v35  ;;  %vm958_vm14 = vcmp.ge.f32.partialorder %v2464_v24, %v2155_v36 }
  0x95   : > { %v1755_v38 = vadd.f32 %v1691_v37, %v1563_v20  ;;  %vm638_vm15 = vmand %vm510_vm8, %vm574_vm12  ;;  %vm959_vm0 = vcmp.ge.f32.partialorder %v2466_v25, %v2155_v36  ;;  %vm1023_vm2 = vcmp.lt.f32.partialorder %v2466_v25, %v364_v17  ;;  %v1502_v39 = vsub.f32 %v396_v35, %v2464_v24 }
  0x96   : > { %v1825_v40 = vmul.f32 %v2526_v57, %v1754_v21  ;;  %vm639_vm3 = vmand %vm511_vm10, %vm575_vm13  ;;  %v2198_v41 = vsel %vm638_vm15, 1.0, %v2369_v34  ;;  %v1503_v42 = vsub.f32 %v396_v35, %v2466_v25  ;;  %v1630_v43 = vsub.f32 %v2464_v24, %v2155_v36 }
  0x97   : > { %v1826_v44 = vmul.f32 %v2528_v58, %v1755_v38  ;;  %v2199_v45 = vsel %vm639_vm3, 1.0, %v2369_v34  ;;  %vm1086_vm1 = vmand %vm958_vm14, %vm1022_vm11  ;;  %v1566_v46 = vmul.f32 %v2198_v41, %v1502_v39  ;;  %v1631_v48 = vsub.f32 %v2466_v25, %v2155_v36 }
  0x98   : > { %vm1087_vm9 = vmand %vm959_vm0, %vm1023_vm2  ;;  %v2262_v8 = vsel %vm1086_vm1, 1.0, %v2369_v34  ;;  %v1567_v49 = vmul.f32 %v2199_v45, %v1503_v42  ;;  %v366_v50 = vmul.f32 0.003937008, %v334_v4  ;;  %v365_v51 = vmul.f32 0.003937008, %v333_v23 }
  0x99   : > { %v1930_v47 = vadd.f32 %v1826_v44, %v1825_v40  ;;  %v2263_v52 = vsel %vm1087_vm9, 1.0, %v2369_v34  ;;  %v1694_v13 = vmul.f32 %v2262_v8, %v1630_v43  ;;  %v2824_v26 = vmul.f32 0.003937008, %v335_v32 }
  0x9a   : > { %v1695_v53 = vmul.f32 %v2263_v52, %v1631_v48  ;;  %v398_v54 = vadd.f32 0.003937008, %v366_v50  ;;  %v2157_v55 = vadd.f32 -0.003937008, %v366_v50  ;;  %vm514_vm4 = vcmp.ge.f32.partialorder %v2464_v24, %v366_v50 }
  0x9b   : > { %1931 = vadd.xlane.f32.xlu0 %v1930_v47  ;;  %v1758_v59 = vadd.f32 %v1694_v13, %v1566_v46  ;;  %vm515_vm5 = vcmp.ge.f32.partialorder %v2466_v25, %v366_v50  ;;  %vm1026_vm6 = vcmp.lt.f32.partialorder %v2464_v24, %v366_v50  ;;  %vm1027_vm7 = vcmp.lt.f32.partialorder %v2466_v25, %v366_v50 }
  0x9c   : > { %v1759_v60 = vadd.f32 %v1695_v53, %v1567_v49  ;;  %vm578_vm8 = vcmp.lt.f32.partialorder %v2464_v24, %v398_v54  ;;  %vm579_vm10 = vcmp.lt.f32.partialorder %v2466_v25, %v398_v54  ;;  %vm962_vm11 = vcmp.ge.f32.partialorder %v2464_v24, %v2157_v55 }
  0x9d   : > { %v1829_v61 = vmul.f32 %v2526_v57, %v1758_v59  ;;  %vm642_vm12 = vmand %vm514_vm4, %vm578_vm8  ;;  %vm963_vm13 = vcmp.ge.f32.partialorder %v2466_v25, %v2157_v55  ;;  %v1506_v62 = vsub.f32 %v398_v54, %v2464_v24  ;;  %v1507_v15 = vsub.f32 %v398_v54, %v2466_v25 }
  0x9e   : > { %v1830_v63 = vmul.f32 %v2528_v58, %v1759_v60  ;;  %vm643_vm14 = vmand %vm515_vm5, %vm579_vm10  ;;  %v2202_v0 = vsel %vm642_vm12, 1.0, %v2369_v34  ;;  %v1634_v1 = vsub.f32 %v2464_v24, %v2157_v55  ;;  %v1635_v2 = vsub.f32 %v2466_v25, %v2157_v55 }
  0x9f   : > { %v2203_v3 = vsel %vm643_vm14, 1.0, %v2369_v34  ;;  %vm1090_vm15 = vmand %vm962_vm11, %vm1026_vm6  ;;  %v1570_v27 = vmul.f32 %v2202_v0, %v1506_v62  ;;  %v397_v5 = vadd.f32 0.003937008, %v365_v51  ;;  %v2156_v6 = vadd.f32 -0.003937008, %v365_v51 }
  0xa0   : > { %v1936_v7 = vadd.f32 %v1830_v63, %v1829_v61  ;;  %vm1091_vm0 = vmand %vm963_vm13, %vm1027_vm7  ;;  %v2266_v9 = vsel %vm1090_vm15, 1.0, %v2369_v34  ;;  %v1571_v56 = vmul.f32 %v2203_v3, %v1507_v15  ;;  %vm512_vm2 = vcmp.ge.f32.partialorder %v2464_v24, %v365_v51 }
  0xa1   : > { %v2267_v10 = vsel %vm1091_vm0, 1.0, %v2369_v34  ;;  %v1698_v11 = vmul.f32 %v2266_v9, %v1634_v1  ;;  %vm513_vm3 = vcmp.ge.f32.partialorder %v2466_v25, %v365_v51  ;;  %vm576_vm1 = vcmp.lt.f32.partialorder %v2464_v24, %v397_v5 }
  0xa2   : > { %1937 = vadd.xlane.f32.xlu2 %v1936_v7  ;;  %v1699_v29 = vmul.f32 %v2267_v10, %v1635_v2  ;;  %vm577_vm9 = vcmp.lt.f32.partialorder %v2466_v25, %v397_v5  ;;  %vm640_vm4 = vmand %vm512_vm2, %vm576_vm1  ;;  %vm960_vm5 = vcmp.ge.f32.partialorder %v2464_v24, %v2156_v6  ;;  %vm961_vm6 = vcmp.ge.f32.partialorder %v2466_v25, %v2156_v6 }
  0xa3   : > { %v1762_v22 = vadd.f32 %v1698_v11, %v1570_v27  ;;  %vm641_vm7 = vmand %vm513_vm3, %vm577_vm9  ;;  %v2200_v30 = vsel %vm640_vm4, 1.0, %v2369_v34  ;;  %vm1024_vm8 = vcmp.lt.f32.partialorder %v2464_v24, %v365_v51  ;;  %vm1025_vm10 = vcmp.lt.f32.partialorder %v2466_v25, %v365_v51 }
  0xa4   : > { %v1763_v31 = vadd.f32 %v1699_v29, %v1571_v56  ;;  %v2201_v12 = vsel %vm641_vm7, 1.0, %v2369_v34  ;;  %vm1088_vm11 = vmand %vm960_vm5, %vm1024_vm8  ;;  %v1504_v14 = vsub.f32 %v397_v5, %v2464_v24  ;;  %v1505_v16 = vsub.f32 %v397_v5, %v2466_v25 }
  0xa5   : > { %v1833_v17 = vmul.f32 %v2526_v57, %v1762_v22  ;;  %vm1089_vm12 = vmand %vm961_vm6, %vm1025_vm10  ;;  %v2264_v4 = vsel %vm1088_vm11, 1.0, %v2369_v34  ;;  %v1632_v18 = vsub.f32 %v2464_v24, %v2156_v6  ;;  %v1633_v20 = vsub.f32 %v2466_v25, %v2156_v6 }
  0xa6   : > { %v1834_v23 = vmul.f32 %v2528_v58, %v1763_v31  ;;  %v2265_v32 = vsel %vm1089_vm12, 1.0, %v2369_v34  ;;  %v1568_v33 = vmul.f32 %v2200_v30, %v1504_v14  ;;  %v1569_v19 = vmul.f32 %v2201_v12, %v1505_v16 }
  0xa7   : > { %v1696_v35 = vmul.f32 %v2264_v4, %v1632_v18  ;;  %v1697_v36 = vmul.f32 %v2265_v32, %v1633_v20  ;;  %v399_v37 = vadd.f32 0.003937008, %v2824_v26  ;;  %v2158_v21 = vadd.f32 -0.003937008, %v2824_v26 }
  0xa8   : > { %v1942_v38 = vadd.f32 %v1834_v23, %v1833_v17  ;;  %vm516_vm13 = vcmp.ge.f32.partialorder %v2464_v24, %v2824_v26  ;;  %vm517_vm14 = vcmp.ge.f32.partialorder %v2466_v25, %v2824_v26  ;;  %vm1028_vm15 = vcmp.lt.f32.partialorder %v2464_v24, %v2824_v26 }
  0xa9   : > { %v1760_v39 = vadd.f32 %v1696_v35, %v1568_v33  ;;  %v1761_v40 = vadd.f32 %v1697_v36, %v1569_v19  ;;  %vm580_vm0 = vcmp.lt.f32.partialorder %v2464_v24, %v399_v37  ;;  %vm581_vm2 = vcmp.lt.f32.partialorder %v2466_v25, %v399_v37 }
  0xaa   : > { %1943 = vadd.xlane.f32.xlu1 %v1942_v38  ;;  %vm644_vm3 = vmand %vm516_vm13, %vm580_vm0  ;;  %vm964_vm1 = vcmp.ge.f32.partialorder %v2464_v24, %v2158_v21  ;;  %vm965_vm9 = vcmp.ge.f32.partialorder %v2466_v25, %v2158_v21  ;;  %vm1029_vm4 = vcmp.lt.f32.partialorder %v2466_v25, %v2824_v26  ;;  %v1508_v41 = vsub.f32 %v399_v37, %v2464_v24 }
  0xab   : > { %v1831_v42 = vmul.f32 %v2526_v57, %v1760_v39  ;;  %v1832_v43 = vmul.f32 %v2528_v58, %v1761_v40  ;;  %vm645_vm5 = vmand %vm517_vm14, %vm581_vm2  ;;  %v2204_v44 = vsel %vm644_vm3, 1.0, %v2369_v34  ;;  %v1509_v45 = vsub.f32 %v399_v37, %v2466_v25 }
  0xac   : > { %v2205_v46 = vsel %vm645_vm5, 1.0, %v2369_v34  ;;  %vm1092_vm6 = vmand %vm964_vm1, %vm1028_vm15  ;;  %v1572_v48 = vmul.f32 %v2204_v44, %v1508_v41  ;;  %v1636_v8 = vsub.f32 %v2464_v24, %v2158_v21  ;;  %v1637_v49 = vsub.f32 %v2466_v25, %v2158_v21 }
  0xad   : > { %v1939_v50 = vadd.f32 %v1832_v43, %v1831_v42  ;;  %vm1093_vm7 = vmand %vm965_vm9, %vm1029_vm4  ;;  %v2268_v51 = vsel %vm1092_vm6, 1.0, %v2369_v34  ;;  %v1573_v47 = vmul.f32 %v2205_v46, %v1509_v45  ;;  %v305_v52 = vadd.s32 128, %v2415_v28 }
  0xae   : > { %v2269_v13 = vsel %vm1093_vm7, 1.0, %v2369_v34  ;;  %v1700_v53 = vmul.f32 %v2268_v51, %v1636_v8  ;;  %v304_v54 = vadd.s32 120, %v2415_v28  ;;  %v306_v26 = vadd.s32 136, %v2415_v28 }
  0xaf   : > { %1940 = vadd.xlane.f32.xlu0 %v1939_v50  ;;  %v1701_v55 = vmul.f32 %v2269_v13, %v1637_v49  ;;  %v337_v59 = vcvt.s32.f32 %v305_v52  ;;  %v2897_v60 = vadd.s32 152, %v2415_v28  ;;  %v2900_v61 = vadd.s32 144, %v2415_v28 }
  0xb0   : > { %v1764_v62 = vadd.f32 %v1700_v53, %v1572_v48  ;;  %v336_v15 = vcvt.s32.f32 %v304_v54  ;;  %v338_v63 = vcvt.s32.f32 %v306_v26 }
  0xb1   : > { %v1765_v0 = vadd.f32 %v1701_v55, %v1573_v47  ;;  %v369_v1 = vmul.f32 0.003937008, %v337_v59  ;;  %v340_v2 = vcvt.s32.f32 %v2897_v60  ;;  %v339_v6 = vcvt.s32.f32 %v2900_v61 }
  0xb2   : > { %v1835_v3 = vmul.f32 %v2526_v57, %v1764_v62  ;;  %v368_v27 = vmul.f32 0.003937008, %v336_v15  ;;  %v2904_v5 = vmul.f32 0.003937008, %v338_v63 }
  0xb3   : > { %v1836_v7 = vmul.f32 %v2528_v58, %v1765_v0  ;;  %v401_v9 = vadd.f32 0.003937008, %v369_v1  ;;  %v2160_v56 = vadd.f32 -0.003937008, %v369_v1  ;;  %vm520_vm8 = vcmp.ge.f32.partialorder %v2464_v24, %v369_v1 }
  0xb4   : > { %vm521_vm10 = vcmp.ge.f32.partialorder %v2466_v25, %v369_v1  ;;  %vm1032_vm11 = vcmp.lt.f32.partialorder %v2464_v24, %v369_v1  ;;  %vm1033_vm12 = vcmp.lt.f32.partialorder %v2466_v25, %v369_v1  ;;  %v400_v10 = vadd.f32 0.003937008, %v368_v27 }
  0xb5   : > { %v1945_v11 = vadd.f32 %v1836_v7, %v1835_v3  ;;  %vm584_vm13 = vcmp.lt.f32.partialorder %v2464_v24, %v401_v9  ;;  %vm585_vm14 = vcmp.lt.f32.partialorder %v2466_v25, %v401_v9  ;;  %vm968_vm15 = vcmp.ge.f32.partialorder %v2464_v24, %v2160_v56 }
  0xb6   : > { %vm648_vm0 = vmand %vm520_vm8, %vm584_vm13  ;;  %vm969_vm2 = vcmp.ge.f32.partialorder %v2466_v25, %v2160_v56  ;;  %v1512_v29 = vsub.f32 %v401_v9, %v2464_v24  ;;  %v1513_v22 = vsub.f32 %v401_v9, %v2466_v25  ;;  %v1640_v30 = vsub.f32 %v2464_v24, %v2160_v56 }
  0xb7   : > { %1946 = vadd.xlane.f32.xlu2 %v1945_v11  ;;  %vm649_vm3 = vmand %vm521_vm10, %vm585_vm14  ;;  %v2208_v31 = vsel %vm648_vm0, 1.0, %v2369_v34  ;;  %v1641_v12 = vsub.f32 %v2466_v25, %v2160_v56  ;;  %v2159_v14 = vadd.f32 -0.003937008, %v368_v27  ;;  %vm518_vm1 = vcmp.ge.f32.partialorder %v2464_v24, %v368_v27 }
  0xb8   : > { %v2209_v16 = vsel %vm649_vm3, 1.0, %v2369_v34  ;;  %vm1096_vm9 = vmand %vm968_vm15, %vm1032_vm11  ;;  %v1576_v17 = vmul.f32 %v2208_v31, %v1512_v29  ;;  %vm519_vm4 = vcmp.ge.f32.partialorder %v2466_v25, %v368_v27  ;;  %vm582_vm5 = vcmp.lt.f32.partialorder %v2464_v24, %v400_v10 }
  0xb9   : > { %vm1097_vm6 = vmand %vm969_vm2, %vm1033_vm12  ;;  %v2272_v4 = vsel %vm1096_vm9, 1.0, %v2369_v34  ;;  %v1577_v18 = vmul.f32 %v2209_v16, %v1513_v22  ;;  %vm583_vm7 = vcmp.lt.f32.partialorder %v2466_v25, %v400_v10  ;;  %vm966_vm8 = vcmp.ge.f32.partialorder %v2464_v24, %v2159_v14 }
  0xba   : > { %v2273_v20 = vsel %vm1097_vm6, 1.0, %v2369_v34  ;;  %v1704_v23 = vmul.f32 %v2272_v4, %v1640_v30  ;;  %vm646_vm10 = vmand %vm518_vm1, %vm582_vm5  ;;  %vm967_vm11 = vcmp.ge.f32.partialorder %v2466_v25, %v2159_v14  ;;  %vm1030_vm13 = vcmp.lt.f32.partialorder %v2464_v24, %v368_v27 }
  0xbb   : > { %v1705_v32 = vmul.f32 %v2273_v20, %v1641_v12  ;;  %vm647_vm14 = vmand %vm519_vm4, %vm583_vm7  ;;  %v2206_v33 = vsel %vm646_vm10, 1.0, %v2369_v34  ;;  %vm1031_vm12 = vcmp.lt.f32.partialorder %v2466_v25, %v368_v27  ;;  %v1510_v19 = vsub.f32 %v400_v10, %v2464_v24 }
  0xbc   : > { %v1768_v35 = vadd.f32 %v1704_v23, %v1576_v17  ;;  %v2207_v36 = vsel %vm647_vm14, 1.0, %v2369_v34  ;;  %vm1094_vm15 = vmand %vm966_vm8, %vm1030_vm13  ;;  %v1511_v37 = vsub.f32 %v400_v10, %v2466_v25  ;;  %v1638_v21 = vsub.f32 %v2464_v24, %v2159_v14 }
  0xbd   : > { %v1769_v38 = vadd.f32 %v1705_v32, %v1577_v18  ;;  %vm1095_vm0 = vmand %vm967_vm11, %vm1031_vm12  ;;  %v2270_v39 = vsel %vm1094_vm15, 1.0, %v2369_v34  ;;  %v1574_v40 = vmul.f32 %v2206_v33, %v1510_v19  ;;  %v1639_v41 = vsub.f32 %v2466_v25, %v2159_v14 }
  0xbe   : > { %v1839_v42 = vmul.f32 %v2526_v57, %v1768_v35  ;;  %v2271_v43 = vsel %vm1095_vm0, 1.0, %v2369_v34  ;;  %v1575_v44 = vmul.f32 %v2207_v36, %v1511_v37  ;;  %v1702_v45 = vmul.f32 %v2270_v39, %v1638_v21 }
  0xbf   : > { %v1840_v46 = vmul.f32 %v2528_v58, %v1769_v38  ;;  %v1703_v48 = vmul.f32 %v2271_v43, %v1639_v41  ;;  %v402_v8 = vadd.f32 0.003937008, %v2904_v5  ;;  %v2161_v49 = vadd.f32 -0.003937008, %v2904_v5 }
  0xc0   : > { %v1766_v50 = vadd.f32 %v1702_v45, %v1574_v40  ;;  %vm522_vm2 = vcmp.ge.f32.partialorder %v2464_v24, %v2904_v5  ;;  %vm523_vm3 = vcmp.ge.f32.partialorder %v2466_v25, %v2904_v5  ;;  %vm1034_vm1 = vcmp.lt.f32.partialorder %v2464_v24, %v2904_v5 }
  0xc1   : > { %v1951_v51 = vadd.f32 %v1840_v46, %v1839_v42  ;;  %v1767_v47 = vadd.f32 %v1703_v48, %v1575_v44  ;;  %vm586_vm9 = vcmp.lt.f32.partialorder %v2464_v24, %v402_v8  ;;  %vm587_vm4 = vcmp.lt.f32.partialorder %v2466_v25, %v402_v8 }
  0xc2   : > { %v1837_v52 = vmul.f32 %v2526_v57, %v1766_v50  ;;  %vm650_vm5 = vmand %vm522_vm2, %vm586_vm9  ;;  %vm970_vm6 = vcmp.ge.f32.partialorder %v2464_v24, %v2161_v49  ;;  %vm971_vm7 = vcmp.ge.f32.partialorder %v2466_v25, %v2161_v49  ;;  %vm1035_vm8 = vcmp.lt.f32.partialorder %v2466_v25, %v2904_v5 }
  0xc3   : > { %1952 = vadd.xlane.f32.xlu1 %v1951_v51  ;;  %v1838_v13 = vmul.f32 %v2528_v58, %v1767_v47  ;;  %vm651_vm10 = vmand %vm523_vm3, %vm587_vm4  ;;  %v2210_v53 = vsel %vm650_vm5, 1.0, %v2369_v34  ;;  %v1514_v54 = vsub.f32 %v402_v8, %v2464_v24  ;;  %v1515_v26 = vsub.f32 %v402_v8, %v2466_v25 }
  0xc4   : > { %v2211_v55 = vsel %vm651_vm10, 1.0, %v2369_v34  ;;  %vm1098_vm11 = vmand %vm970_vm6, %vm1034_vm1  ;;  %v1642_v59 = vsub.f32 %v2464_v24, %v2161_v49  ;;  %v1643_v62 = vsub.f32 %v2466_v25, %v2161_v49  ;;  %v372_v15 = vmul.f32 0.003937008, %v340_v2 }
  0xc5   : > { %v1948_v63 = vadd.f32 %v1838_v13, %v1837_v52  ;;  %vm1099_vm13 = vmand %vm971_vm7, %vm1035_vm8  ;;  %v2274_v0 = vsel %vm1098_vm11, 1.0, %v2369_v34  ;;  %v1578_v1 = vmul.f32 %v2210_v53, %v1514_v54  ;;  %v1579_v3 = vmul.f32 %v2211_v55, %v1515_v26 }
  0xc6   : > { %v2275_v27 = vsel %vm1099_vm13, 1.0, %v2369_v34  ;;  %v1706_v7 = vmul.f32 %v2274_v0, %v1642_v59  ;;  %v404_v9 = vadd.f32 0.003937008, %v372_v15  ;;  %v2163_v56 = vadd.f32 -0.003937008, %v372_v15 }
  0xc7   : > { %1949 = vadd.xlane.f32.xlu0 %v1948_v63  ;;  %v1707_v5 = vmul.f32 %v2275_v27, %v1643_v62  ;;  %vm526_vm14 = vcmp.ge.f32.partialorder %v2464_v24, %v372_v15  ;;  %vm527_vm12 = vcmp.ge.f32.partialorder %v2466_v25, %v372_v15  ;;  %vm1038_vm15 = vcmp.lt.f32.partialorder %v2464_v24, %v372_v15 }
  0xc8   : > { %v1770_v60 = vadd.f32 %v1706_v7, %v1578_v1  ;;  %vm590_vm0 = vcmp.lt.f32.partialorder %v2464_v24, %v404_v9  ;;  %vm591_vm2 = vcmp.lt.f32.partialorder %v2466_v25, %v404_v9  ;;  %vm974_vm3 = vcmp.ge.f32.partialorder %v2464_v24, %v2163_v56 }
  0xc9   : > { %v1771_v2 = vadd.f32 %v1707_v5, %v1579_v3  ;;  %vm654_vm1 = vmand %vm526_vm14, %vm590_vm0  ;;  %vm975_vm9 = vcmp.ge.f32.partialorder %v2466_v25, %v2163_v56  ;;  %vm1039_vm4 = vcmp.lt.f32.partialorder %v2466_v25, %v372_v15  ;;  %v1518_v10 = vsub.f32 %v404_v9, %v2464_v24 }
  0xca   : > { %v1841_v11 = vmul.f32 %v2526_v57, %v1770_v60  ;;  %vm655_vm5 = vmand %vm527_vm12, %vm591_vm2  ;;  %v2214_v29 = vsel %vm654_vm1, 1.0, %v2369_v34  ;;  %v1519_v22 = vsub.f32 %v404_v9, %v2466_v25  ;;  %v1646_v30 = vsub.f32 %v2464_v24, %v2163_v56 }
  0xcb   : > { %v1842_v31 = vmul.f32 %v2528_v58, %v1771_v2  ;;  %v2215_v12 = vsel %vm655_vm5, 1.0, %v2369_v34  ;;  %vm1102_vm6 = vmand %vm974_vm3, %vm1038_vm15  ;;  %v1582_v14 = vmul.f32 %v2214_v29, %v1518_v10  ;;  %v1647_v16 = vsub.f32 %v2466_v25, %v2163_v56 }
  0xcc   : > { %vm1103_vm7 = vmand %vm975_vm9, %vm1039_vm4  ;;  %v2278_v17 = vsel %vm1102_vm6, 1.0, %v2369_v34  ;;  %v1583_v4 = vmul.f32 %v2215_v12, %v1519_v22  ;;  %v371_v18 = vmul.f32 0.003937008, %v339_v6  ;;  %v309_v20 = vadd.s32 160, %v2415_v28 }
  0xcd   : > { %v1954_v23 = vadd.f32 %v1842_v31, %v1841_v11  ;;  %v2279_v32 = vsel %vm1103_vm7, 1.0, %v2369_v34  ;;  %v1710_v33 = vmul.f32 %v2278_v17, %v1646_v30  ;;  %v311_v19 = vadd.s32 176, %v2415_v28 }
  0xce   : > { %v1711_v35 = vmul.f32 %v2279_v32, %v1647_v16  ;;  %v403_v36 = vadd.f32 0.003937008, %v371_v18  ;;  %v2162_v37 = vadd.f32 -0.003937008, %v371_v18  ;;  %vm524_vm8 = vcmp.ge.f32.partialorder %v2464_v24, %v371_v18 }
  0xcf   : > { %1955 = vadd.xlane.f32.xlu2 %v1954_v23  ;;  %v1774_v21 = vadd.f32 %v1710_v33, %v1582_v14  ;;  %vm525_vm10 = vcmp.ge.f32.partialorder %v2466_v25, %v371_v18  ;;  %vm1036_vm11 = vcmp.lt.f32.partialorder %v2464_v24, %v371_v18  ;;  %vm1037_vm13 = vcmp.lt.f32.partialorder %v2466_v25, %v371_v18 }
  0xd0   : > { %v1775_v61 = vadd.f32 %v1711_v35, %v1583_v4  ;;  %vm588_vm14 = vcmp.lt.f32.partialorder %v2464_v24, %v403_v36  ;;  %vm589_vm12 = vcmp.lt.f32.partialorder %v2466_v25, %v403_v36  ;;  %vm972_vm15 = vcmp.ge.f32.partialorder %v2464_v24, %v2162_v37 }
  0xd1   : > { %v1845_v6 = vmul.f32 %v2526_v57, %v1774_v21  ;;  %vm652_vm0 = vmand %vm524_vm8, %vm588_vm14  ;;  %vm973_vm2 = vcmp.ge.f32.partialorder %v2466_v25, %v2162_v37  ;;  %v1516_v38 = vsub.f32 %v403_v36, %v2464_v24  ;;  %v1517_v39 = vsub.f32 %v403_v36, %v2466_v25 }
  0xd2   : > { %v1846_v40 = vmul.f32 %v2528_v58, %v1775_v61  ;;  %vm653_vm3 = vmand %vm525_vm10, %vm589_vm12  ;;  %v2212_v41 = vsel %vm652_vm0, 1.0, %v2369_v34  ;;  %v1644_v42 = vsub.f32 %v2464_v24, %v2162_v37  ;;  %v1645_v43 = vsub.f32 %v2466_v25, %v2162_v37 }
  0xd3   : > { %v2213_v44 = vsel %vm653_vm3, 1.0, %v2369_v34  ;;  %vm1100_vm1 = vmand %vm972_vm15, %vm1036_vm11  ;;  %v1580_v45 = vmul.f32 %v2212_v41, %v1516_v38  ;;  %v341_v46 = vcvt.s32.f32 %v309_v20  ;;  %v343_v48 = vcvt.s32.f32 %v311_v19 }
  0xd4   : > { %v1960_v8 = vadd.f32 %v1846_v40, %v1845_v6  ;;  %vm1101_vm9 = vmand %vm973_vm2, %vm1037_vm13  ;;  %v2276_v49 = vsel %vm1100_vm1, 1.0, %v2369_v34  ;;  %v1581_v50 = vmul.f32 %v2213_v44, %v1517_v39  ;;  %v3023_v51 = vadd.s32 168, %v2415_v28 }
  0xd5   : > { %v2277_v47 = vsel %vm1101_vm9, 1.0, %v2369_v34  ;;  %v1708_v52 = vmul.f32 %v2276_v49, %v1644_v42  ;;  %v373_v13 = vmul.f32 0.003937008, %v341_v46  ;;  %v375_v53 = vmul.f32 0.003937008, %v343_v48 }
  0xd6   : > { %1961 = vadd.xlane.f32.xlu1 %v1960_v8  ;;  %v1709_v54 = vmul.f32 %v2277_v47, %v1645_v43  ;;  %v342_v26 = vcvt.s32.f32 %v3023_v51  ;;  %v3028_v55 = vadd.s32 184, %v2415_v28  ;;  %v3031_v59 = vadd.s32 200, %v2415_v28 }
  0xd7   : > { %v1772_v62 = vadd.f32 %v1708_v52, %v1580_v45  ;;  %v405_v15 = vadd.f32 0.003937008, %v373_v13  ;;  %v2164_v63 = vadd.f32 -0.003937008, %v373_v13  ;;  %vm528_vm4 = vcmp.ge.f32.partialorder %v2464_v24, %v373_v13 }
  0xd8   : > { %v1773_v0 = vadd.f32 %v1709_v54, %v1581_v50  ;;  %vm529_vm5 = vcmp.ge.f32.partialorder %v2466_v25, %v373_v13  ;;  %vm1040_vm6 = vcmp.lt.f32.partialorder %v2464_v24, %v373_v13  ;;  %vm1041_vm7 = vcmp.lt.f32.partialorder %v2466_v25, %v373_v13 }
  0xd9   : > { %v1843_v1 = vmul.f32 %v2526_v57, %v1772_v62  ;;  %vm592_vm8 = vcmp.lt.f32.partialorder %v2464_v24, %v405_v15  ;;  %vm593_vm10 = vcmp.lt.f32.partialorder %v2466_v25, %v405_v15  ;;  %vm976_vm11 = vcmp.ge.f32.partialorder %v2464_v24, %v2164_v63 }
  0xda   : > { %v1844_v3 = vmul.f32 %v2528_v58, %v1773_v0  ;;  %vm656_vm13 = vmand %vm528_vm4, %vm592_vm8  ;;  %vm977_vm14 = vcmp.ge.f32.partialorder %v2466_v25, %v2164_v63  ;;  %v1520_v27 = vsub.f32 %v405_v15, %v2464_v24  ;;  %v1521_v7 = vsub.f32 %v405_v15, %v2466_v25 }
  0xdb   : > { %vm657_vm12 = vmand %vm529_vm5, %vm593_vm10  ;;  %v2216_v9 = vsel %vm656_vm13, 1.0, %v2369_v34  ;;  %v1648_v56 = vsub.f32 %v2464_v24, %v2164_v63  ;;  %v1649_v5 = vsub.f32 %v2466_v25, %v2164_v63  ;;  %v407_v60 = vadd.f32 0.003937008, %v375_v53 }
  0xdc   : > { %v1957_v2 = vadd.f32 %v1844_v3, %v1843_v1  ;;  %v2217_v10 = vsel %vm657_vm12, 1.0, %v2369_v34  ;;  %vm1104_vm15 = vmand %vm976_vm11, %vm1040_vm6  ;;  %v1584_v11 = vmul.f32 %v2216_v9, %v1520_v27  ;;  %v2166_v29 = vadd.f32 -0.003937008, %v375_v53 }
  0xdd   : > { %vm1105_vm0 = vmand %vm977_vm14, %vm1041_vm7  ;;  %v2280_v22 = vsel %vm1104_vm15, 1.0, %v2369_v34  ;;  %v1585_v30 = vmul.f32 %v2217_v10, %v1521_v7  ;;  %vm532_vm2 = vcmp.ge.f32.partialorder %v2464_v24, %v375_v53  ;;  %vm533_vm3 = vcmp.ge.f32.partialorder %v2466_v25, %v375_v53 }
  0xde   : > { %1958 = vadd.xlane.f32.xlu0 %v1957_v2  ;;  %v2281_v31 = vsel %vm1105_vm0, 1.0, %v2369_v34  ;;  %v1712_v12 = vmul.f32 %v2280_v22, %v1648_v56  ;;  %vm596_vm1 = vcmp.lt.f32.partialorder %v2464_v24, %v407_v60  ;;  %vm597_vm9 = vcmp.lt.f32.partialorder %v2466_v25, %v407_v60 }
  0xdf   : > { %v1713_v14 = vmul.f32 %v2281_v31, %v1649_v5  ;;  %vm660_vm4 = vmand %vm532_vm2, %vm596_vm1  ;;  %vm980_vm5 = vcmp.ge.f32.partialorder %v2464_v24, %v2166_v29  ;;  %vm981_vm6 = vcmp.ge.f32.partialorder %v2466_v25, %v2166_v29  ;;  %vm1044_vm7 = vcmp.lt.f32.partialorder %v2464_v24, %v375_v53 }
  0xe0   : > { %v1776_v16 = vadd.f32 %v1712_v12, %v1584_v11  ;;  %vm661_vm8 = vmand %vm533_vm3, %vm597_vm9  ;;  %v2220_v17 = vsel %vm660_vm4, 1.0, %v2369_v34  ;;  %vm1045_vm10 = vcmp.lt.f32.partialorder %v2466_v25, %v375_v53  ;;  %v1524_v4 = vsub.f32 %v407_v60, %v2464_v24 }
  0xe1   : > { %v1777_v18 = vadd.f32 %v1713_v14, %v1585_v30  ;;  %v2221_v20 = vsel %vm661_vm8, 1.0, %v2369_v34  ;;  %vm1108_vm11 = vmand %vm980_vm5, %vm1044_vm7  ;;  %v1525_v23 = vsub.f32 %v407_v60, %v2466_v25  ;;  %v1652_v32 = vsub.f32 %v2464_v24, %v2166_v29 }
  0xe2   : > { %v1847_v33 = vmul.f32 %v2526_v57, %v1776_v16  ;;  %vm1109_vm13 = vmand %vm981_vm6, %vm1045_vm10  ;;  %v2284_v19 = vsel %vm1108_vm11, 1.0, %v2369_v34  ;;  %v1588_v35 = vmul.f32 %v2220_v17, %v1524_v4  ;;  %v1653_v36 = vsub.f32 %v2466_v25, %v2166_v29 }
  0xe3   : > { %v1848_v37 = vmul.f32 %v2528_v58, %v1777_v18  ;;  %v2285_v21 = vsel %vm1109_vm13, 1.0, %v2369_v34  ;;  %v1589_v61 = vmul.f32 %v2221_v20, %v1525_v23  ;;  %v1716_v6 = vmul.f32 %v2284_v19, %v1652_v32 }
  0xe4   : > { %v1717_v38 = vmul.f32 %v2285_v21, %v1653_v36  ;;  %v374_v39 = vmul.f32 0.003937008, %v342_v26  ;;  %v344_v40 = vcvt.s32.f32 %v3028_v55  ;;  %v346_v41 = vcvt.s32.f32 %v3031_v59 }
  0xe5   : > { %v1963_v42 = vadd.f32 %v1848_v37, %v1847_v33  ;;  %v1780_v43 = vadd.f32 %v1716_v6, %v1588_v35  ;;  %v3078_v44 = vadd.s32 192, %v2415_v28  ;;  %v3081_v45 = vadd.s32 208, %v2415_v28 }
  0xe6   : > { %v1781_v46 = vadd.f32 %v1717_v38, %v1589_v61  ;;  %v406_v48 = vadd.f32 0.003937008, %v374_v39  ;;  %v2165_v8 = vadd.f32 -0.003937008, %v374_v39  ;;  %vm530_vm14 = vcmp.ge.f32.partialorder %v2464_v24, %v374_v39 }
  0xe7   : > { %1964 = vadd.xlane.f32.xlu2 %v1963_v42  ;;  %v1851_v49 = vmul.f32 %v2526_v57, %v1780_v43  ;;  %vm531_vm12 = vcmp.ge.f32.partialorder %v2466_v25, %v374_v39  ;;  %vm1042_vm15 = vcmp.lt.f32.partialorder %v2464_v24, %v374_v39  ;;  %vm1043_vm0 = vcmp.lt.f32.partialorder %v2466_v25, %v374_v39 }
  0xe8   : > { %v1852_v50 = vmul.f32 %v2528_v58, %v1781_v46  ;;  %vm594_vm2 = vcmp.lt.f32.partialorder %v2464_v24, %v406_v48  ;;  %vm595_vm3 = vcmp.lt.f32.partialorder %v2466_v25, %v406_v48  ;;  %vm978_vm1 = vcmp.ge.f32.partialorder %v2464_v24, %v2165_v8 }
  0xe9   : > { %vm658_vm9 = vmand %vm530_vm14, %vm594_vm2  ;;  %vm979_vm4 = vcmp.ge.f32.partialorder %v2466_v25, %v2165_v8  ;;  %v1522_v51 = vsub.f32 %v406_v48, %v2464_v24  ;;  %v1523_v47 = vsub.f32 %v406_v48, %v2466_v25  ;;  %v1650_v52 = vsub.f32 %v2464_v24, %v2165_v8 }
  0xea   : > { %v1969_v13 = vadd.f32 %v1852_v50, %v1851_v49  ;;  %vm659_vm5 = vmand %vm531_vm12, %vm595_vm3  ;;  %v2218_v53 = vsel %vm658_vm9, 1.0, %v2369_v34  ;;  %v1651_v54 = vsub.f32 %v2466_v25, %v2165_v8  ;;  %v376_v26 = vmul.f32 0.003937008, %v344_v40 }
  0xeb   : > { %v2219_v55 = vsel %vm659_vm5, 1.0, %v2369_v34  ;;  %vm1106_vm6 = vmand %vm978_vm1, %vm1042_vm15  ;;  %v1586_v59 = vmul.f32 %v2218_v53, %v1522_v51  ;;  %v3101_v62 = vmul.f32 0.003937008, %v346_v41  ;;  %v345_v15 = vcvt.s32.f32 %v3078_v44 }
  0xec   : > { %1970 = vadd.xlane.f32.xlu1 %v1969_v13  ;;  %vm1107_vm7 = vmand %vm979_vm4, %vm1043_vm0  ;;  %v2282_v63 = vsel %vm1106_vm6, 1.0, %v2369_v34  ;;  %v1587_v0 = vmul.f32 %v2219_v55, %v1523_v47  ;;  %v408_v1 = vadd.f32 0.003937008, %v376_v26  ;;  %v2167_v3 = vadd.f32 -0.003937008, %v376_v26 }
  0xed   : > { %v2283_v27 = vsel %vm1107_vm7, 1.0, %v2369_v34  ;;  %v1714_v7 = vmul.f32 %v2282_v63, %v1650_v52  ;;  %vm534_vm8 = vcmp.ge.f32.partialorder %v2464_v24, %v376_v26  ;;  %vm535_vm10 = vcmp.ge.f32.partialorder %v2466_v25, %v376_v26 }
  0xee   : > { %v1715_v9 = vmul.f32 %v2283_v27, %v1651_v54  ;;  %vm598_vm11 = vcmp.lt.f32.partialorder %v2464_v24, %v408_v1  ;;  %vm599_vm13 = vcmp.lt.f32.partialorder %v2466_v25, %v408_v1  ;;  %vm982_vm14 = vcmp.ge.f32.partialorder %v2464_v24, %v2167_v3 }
  0xef   : > { %v1778_v56 = vadd.f32 %v1714_v7, %v1586_v59  ;;  %vm662_vm12 = vmand %vm534_vm8, %vm598_vm11  ;;  %vm983_vm15 = vcmp.ge.f32.partialorder %v2466_v25, %v2167_v3  ;;  %vm1046_vm0 = vcmp.lt.f32.partialorder %v2464_v24, %v376_v26  ;;  %vm1047_vm2 = vcmp.lt.f32.partialorder %v2466_v25, %v376_v26 }
  0xf0   : > { %v1779_v5 = vadd.f32 %v1715_v9, %v1587_v0  ;;  %vm663_vm3 = vmand %vm535_vm10, %vm599_vm13  ;;  %v2222_v60 = vsel %vm662_vm12, 1.0, %v2369_v34  ;;  %v1526_v2 = vsub.f32 %v408_v1, %v2464_v24  ;;  %v1527_v10 = vsub.f32 %v408_v1, %v2466_v25 }
  0xf1   : > { %v1849_v11 = vmul.f32 %v2526_v57, %v1778_v56  ;;  %v2223_v29 = vsel %vm663_vm3, 1.0, %v2369_v34  ;;  %vm1110_vm1 = vmand %vm982_vm14, %vm1046_vm0  ;;  %v1654_v22 = vsub.f32 %v2464_v24, %v2167_v3  ;;  %v1655_v30 = vsub.f32 %v2466_v25, %v2167_v3 }
  0xf2   : > { %v1850_v31 = vmul.f32 %v2528_v58, %v1779_v5  ;;  %vm1111_vm9 = vmand %vm983_vm15, %vm1047_vm2  ;;  %v2286_v12 = vsel %vm1110_vm1, 1.0, %v2369_v34  ;;  %v1590_v14 = vmul.f32 %v2222_v60, %v1526_v2  ;;  %v1591_v16 = vmul.f32 %v2223_v29, %v1527_v10 }
  0xf3   : > { %v2287_v17 = vsel %vm1111_vm9, 1.0, %v2369_v34  ;;  %v1718_v4 = vmul.f32 %v2286_v12, %v1654_v22  ;;  %v410_v18 = vadd.f32 0.003937008, %v3101_v62  ;;  %v2169_v20 = vadd.f32 -0.003937008, %v3101_v62 }
  0xf4   : > { %v1966_v23 = vadd.f32 %v1850_v31, %v1849_v11  ;;  %v1719_v32 = vmul.f32 %v2287_v17, %v1655_v30  ;;  %vm538_vm4 = vcmp.ge.f32.partialorder %v2464_v24, %v3101_v62  ;;  %vm539_vm5 = vcmp.ge.f32.partialorder %v2466_v25, %v3101_v62 }
  0xf5   : > { %v1782_v33 = vadd.f32 %v1718_v4, %v1590_v14  ;;  %vm602_vm6 = vcmp.lt.f32.partialorder %v2464_v24, %v410_v18  ;;  %vm603_vm7 = vcmp.lt.f32.partialorder %v2466_v25, %v410_v18  ;;  %vm986_vm8 = vcmp.ge.f32.partialorder %v2464_v24, %v2169_v20 }
  0xf6   : > { %1967 = vadd.xlane.f32.xlu0 %v1966_v23  ;;  %v1783_v19 = vadd.f32 %v1719_v32, %v1591_v16  ;;  %vm666_vm10 = vmand %vm538_vm4, %vm602_vm6  ;;  %vm987_vm11 = vcmp.ge.f32.partialorder %v2466_v25, %v2169_v20  ;;  %vm1050_vm13 = vcmp.lt.f32.partialorder %v2464_v24, %v3101_v62  ;;  %vm1051_vm14 = vcmp.lt.f32.partialorder %v2466_v25, %v3101_v62 }
  0xf7   : > { %v1853_v35 = vmul.f32 %v2526_v57, %v1782_v33  ;;  %vm667_vm12 = vmand %vm539_vm5, %vm603_vm7  ;;  %v2226_v36 = vsel %vm666_vm10, 1.0, %v2369_v34  ;;  %v1530_v37 = vsub.f32 %v410_v18, %v2464_v24  ;;  %v1531_v21 = vsub.f32 %v410_v18, %v2466_v25 }
  0xf8   : > { %v1854_v61 = vmul.f32 %v2528_v58, %v1783_v19  ;;  %v2227_v6 = vsel %vm667_vm12, 1.0, %v2369_v34  ;;  %vm1114_vm15 = vmand %vm986_vm8, %vm1050_vm13  ;;  %v1658_v38 = vsub.f32 %v2464_v24, %v2169_v20  ;;  %v1659_v39 = vsub.f32 %v2466_v25, %v2169_v20 }
  0xf9   : > { %vm1115_vm0 = vmand %vm987_vm11, %vm1051_vm14  ;;  %v2290_v40 = vsel %vm1114_vm15, 1.0, %v2369_v34  ;;  %v1594_v41 = vmul.f32 %v2226_v36, %v1530_v37  ;;  %v1595_v42 = vmul.f32 %v2227_v6, %v1531_v21  ;;  %v377_v43 = vmul.f32 0.003937008, %v345_v15 }
  0xfa   : > { %v1972_v46 = vadd.f32 %v1854_v61, %v1853_v35  ;;  %v2291_v48 = vsel %vm1115_vm0, 1.0, %v2369_v34  ;;  %v1722_v8 = vmul.f32 %v2290_v40, %v1658_v38  ;;  %v347_v49 = vcvt.s32.f32 %v3081_v45 }
  0xfb   : > { %v1723_v50 = vmul.f32 %v2291_v48, %v1659_v39  ;;  %v409_v51 = vadd.f32 0.003937008, %v377_v43  ;;  %v2168_v47 = vadd.f32 -0.003937008, %v377_v43  ;;  %vm536_vm2 = vcmp.ge.f32.partialorder %v2464_v24, %v377_v43 }
  0xfc   : > { %1973 = vadd.xlane.f32.xlu2 %v1972_v46  ;;  %v1786_v52 = vadd.f32 %v1722_v8, %v1594_v41  ;;  %vm537_vm3 = vcmp.ge.f32.partialorder %v2466_v25, %v377_v43  ;;  %vm1048_vm1 = vcmp.lt.f32.partialorder %v2464_v24, %v377_v43  ;;  %vm1049_vm9 = vcmp.lt.f32.partialorder %v2466_v25, %v377_v43 }
  0xfd   : > { %v1787_v44 = vadd.f32 %v1723_v50, %v1595_v42  ;;  %vm600_vm4 = vcmp.lt.f32.partialorder %v2464_v24, %v409_v51  ;;  %vm601_vm5 = vcmp.lt.f32.partialorder %v2466_v25, %v409_v51  ;;  %vm984_vm6 = vcmp.ge.f32.partialorder %v2464_v24, %v2168_v47 }
  0xfe   : > { %v1857_v45 = vmul.f32 %v2526_v57, %v1786_v52  ;;  %vm664_vm7 = vmand %vm536_vm2, %vm600_vm4  ;;  %vm985_vm8 = vcmp.ge.f32.partialorder %v2466_v25, %v2168_v47  ;;  %v1528_v13 = vsub.f32 %v409_v51, %v2464_v24  ;;  %v1529_v53 = vsub.f32 %v409_v51, %v2466_v25 }
  0xff   : > { %v1858_v54 = vmul.f32 %v2528_v58, %v1787_v44  ;;  %vm665_vm10 = vmand %vm537_vm3, %vm601_vm5  ;;  %v2224_v26 = vsel %vm664_vm7, 1.0, %v2369_v34  ;;  %v1656_v55 = vsub.f32 %v2464_v24, %v2168_v47  ;;  %v1657_v59 = vsub.f32 %v2466_v25, %v2168_v47 }
 0x100   : > { %v2225_v62 = vsel %vm665_vm10, 1.0, %v2369_v34  ;;  %vm1112_vm11 = vmand %vm984_vm6, %vm1048_vm1  ;;  %v1592_v15 = vmul.f32 %v2224_v26, %v1528_v13  ;;  %v379_v63 = vmul.f32 0.003937008, %v347_v49  ;;  %v317_v0 = vadd.s32 224, %v2415_v28 }
 0x101   : > { %v1978_v1 = vadd.f32 %v1858_v54, %v1857_v45  ;;  %vm1113_vm13 = vmand %vm985_vm8, %vm1049_vm9  ;;  %v2288_v3 = vsel %vm1112_vm11, 1.0, %v2369_v34  ;;  %v1593_v27 = vmul.f32 %v2225_v62, %v1529_v53  ;;  %v316_v7 = vadd.s32 216, %v2415_v28 }
 0x102   : > { %v2289_v9 = vsel %vm1113_vm13, 1.0, %v2369_v34  ;;  %v1720_v56 = vmul.f32 %v2288_v3, %v1656_v55  ;;  %v411_v5 = vadd.f32 0.003937008, %v379_v63  ;;  %v2170_v60 = vadd.f32 -0.003937008, %v379_v63 }
 0x103   : > { %1979 = vadd.xlane.f32.xlu1 %v1978_v1  ;;  %v1721_v2 = vmul.f32 %v2289_v9, %v1657_v59  ;;  %vm540_vm14 = vcmp.ge.f32.partialorder %v2464_v24, %v379_v63  ;;  %vm541_vm12 = vcmp.ge.f32.partialorder %v2466_v25, %v379_v63  ;;  %vm1052_vm15 = vcmp.lt.f32.partialorder %v2464_v24, %v379_v63 }
 0x104   : > { %v1784_v10 = vadd.f32 %v1720_v56, %v1592_v15  ;;  %vm604_vm0 = vcmp.lt.f32.partialorder %v2464_v24, %v411_v5  ;;  %vm605_vm2 = vcmp.lt.f32.partialorder %v2466_v25, %v411_v5  ;;  %vm988_vm3 = vcmp.ge.f32.partialorder %v2464_v24, %v2170_v60 }
 0x105   : > { %v1785_v11 = vadd.f32 %v1721_v2, %v1593_v27  ;;  %vm668_vm1 = vmand %vm540_vm14, %vm604_vm0  ;;  %vm989_vm9 = vcmp.ge.f32.partialorder %v2466_v25, %v2170_v60  ;;  %vm1053_vm4 = vcmp.lt.f32.partialorder %v2466_v25, %v379_v63  ;;  %v1532_v29 = vsub.f32 %v411_v5, %v2464_v24 }
 0x106   : > { %v1855_v22 = vmul.f32 %v2526_v57, %v1784_v10  ;;  %vm669_vm5 = vmand %vm541_vm12, %vm605_vm2  ;;  %v2228_v30 = vsel %vm668_vm1, 1.0, %v2369_v34  ;;  %v1533_v31 = vsub.f32 %v411_v5, %v2466_v25  ;;  %v1660_v12 = vsub.f32 %v2464_v24, %v2170_v60 }
 0x107   : > { %v1856_v14 = vmul.f32 %v2528_v58, %v1785_v11  ;;  %v2229_v16 = vsel %vm669_vm5, 1.0, %v2369_v34  ;;  %vm1116_vm6 = vmand %vm988_vm3, %vm1052_vm15  ;;  %v1596_v17 = vmul.f32 %v2228_v30, %v1532_v29  ;;  %v1661_v4 = vsub.f32 %v2466_v25, %v2170_v60 }
 0x108   : > { %vm1117_vm7 = vmand %vm989_vm9, %vm1053_vm4  ;;  %v2292_v18 = vsel %vm1116_vm6, 1.0, %v2369_v34  ;;  %v1597_v20 = vmul.f32 %v2229_v16, %v1533_v31  ;;  %v349_v23 = vcvt.s32.f32 %v317_v0  ;;  %v348_v32 = vcvt.s32.f32 %v316_v7 }
 0x109   : > { %v1975_v33 = vadd.f32 %v1856_v14, %v1855_v22  ;;  %v2293_v19 = vsel %vm1117_vm7, 1.0, %v2369_v34  ;;  %v1724_v35 = vmul.f32 %v2292_v18, %v1660_v12  ;;  %v3200_v36 = vadd.s32 232, %v2415_v28 }
 0x10a   : > { %v1725_v37 = vmul.f32 %v2293_v19, %v1661_v4  ;;  %v381_v21 = vmul.f32 0.003937008, %v349_v23  ;;  %v380_v61 = vmul.f32 0.003937008, %v348_v32  ;;  %v3204_v39 = vadd.s32 248, %v2415_v28  ;;  %v3255_v4 = vpop.xlane.xlu1 %1910 }
 0x10b   : > { %1976 = vadd.xlane.f32.xlu0 %v1975_v33  ;;  %v1788_v6 = vadd.f32 %v1724_v35, %v1596_v17  ;;  %v350_v38 = vcvt.s32.f32 %v3200_v36  ;;  %v3207_v40 = vadd.s32 240, %v2415_v28 }
 0x10c   : > { %v1789_v41 = vadd.f32 %v1725_v37, %v1597_v20  ;;  %v413_v42 = vadd.f32 0.003937008, %v381_v21  ;;  %v2172_v43 = vadd.f32 -0.003937008, %v381_v21  ;;  %vm544_vm8 = vcmp.ge.f32.partialorder %v2464_v24, %v381_v21 }
 0x10d   : > { %v1859_v46 = vmul.f32 %v2526_v57, %v1788_v6  ;;  %vm545_vm10 = vcmp.ge.f32.partialorder %v2466_v25, %v381_v21  ;;  %vm1056_vm11 = vcmp.lt.f32.partialorder %v2464_v24, %v381_v21  ;;  %vm1057_vm13 = vcmp.lt.f32.partialorder %v2466_v25, %v381_v21 }
 0x10e   : > { %v1860_v48 = vmul.f32 %v2528_v58, %v1789_v41  ;;  %vm608_vm14 = vcmp.lt.f32.partialorder %v2464_v24, %v413_v42  ;;  %vm609_vm12 = vcmp.lt.f32.partialorder %v2466_v25, %v413_v42  ;;  %vm992_vm15 = vcmp.ge.f32.partialorder %v2464_v24, %v2172_v43 }
 0x10f   : > { %vm672_vm0 = vmand %vm544_vm8, %vm608_vm14  ;;  %vm993_vm2 = vcmp.ge.f32.partialorder %v2466_v25, %v2172_v43  ;;  %v1536_v28 = vsub.f32 %v413_v42, %v2464_v24  ;;  %v1537_v8 = vsub.f32 %v413_v42, %v2466_v25  ;;  %v1664_v49 = vsub.f32 %v2464_v24, %v2172_v43 }
 0x110   : > { %v1981_v50 = vadd.f32 %v1860_v48, %v1859_v46  ;;  %vm673_vm3 = vmand %vm545_vm10, %vm609_vm12  ;;  %v2232_v51 = vsel %vm672_vm0, 1.0, %v2369_v34  ;;  %v1665_v47 = vsub.f32 %v2466_v25, %v2172_v43  ;;  %v412_v52 = vadd.f32 0.003937008, %v380_v61 }
 0x111   : > { %v2233_v44 = vsel %vm673_vm3, 1.0, %v2369_v34  ;;  %vm1120_vm1 = vmand %vm992_vm15, %vm1056_vm11  ;;  %v1600_v45 = vmul.f32 %v2232_v51, %v1536_v28  ;;  %v2171_v13 = vadd.f32 -0.003937008, %v380_v61  ;;  %vm542_vm9 = vcmp.ge.f32.partialorder %v2464_v24, %v380_v61 }
 0x112   : > { %1982 = vadd.xlane.f32.xlu2 %v1981_v50  ;;  %vm1121_vm4 = vmand %vm993_vm2, %vm1057_vm13  ;;  %v2296_v53 = vsel %vm1120_vm1, 1.0, %v2369_v34  ;;  %v1601_v54 = vmul.f32 %v2233_v44, %v1537_v8  ;;  %vm543_vm5 = vcmp.ge.f32.partialorder %v2466_v25, %v380_v61  ;;  %vm606_vm6 = vcmp.lt.f32.partialorder %v2464_v24, %v412_v52  ;;  %v3295_v8 = vpop.xlane.xlu0 %1904  ;;  %v3303_v50 = vpop.xlane.xlu2 %1916 }
 0x113   : > { %v2297_v26 = vsel %vm1121_vm4, 1.0, %v2369_v34  ;;  %v1728_v55 = vmul.f32 %v2296_v53, %v1664_v49  ;;  %vm607_vm7 = vcmp.lt.f32.partialorder %v2466_v25, %v412_v52  ;;  %vm670_vm8 = vmand %vm542_vm9, %vm606_vm6  ;;  %vm990_vm10 = vcmp.ge.f32.partialorder %v2464_v24, %v2171_v13 }
 0x114   : > { %v1729_v59 = vmul.f32 %v2297_v26, %v1665_v47  ;;  %vm671_vm11 = vmand %vm543_vm5, %vm607_vm7  ;;  %v2230_v62 = vsel %vm670_vm8, 1.0, %v2369_v34  ;;  %vm991_vm13 = vcmp.ge.f32.partialorder %v2466_v25, %v2171_v13  ;;  %vm1054_vm14 = vcmp.lt.f32.partialorder %v2464_v24, %v380_v61  ;;  %v3309_v47 = vpop.xlane.xlu1 %1913 }
 0x115   : > { %v1792_v15 = vadd.f32 %v1728_v55, %v1600_v45  ;;  %v2231_v63 = vsel %vm671_vm11, 1.0, %v2369_v34  ;;  %vm1055_vm12 = vcmp.lt.f32.partialorder %v2466_v25, %v380_v61  ;;  %vm1118_vm15 = vmand %vm990_vm10, %vm1054_vm14  ;;  %v1534_v0 = vsub.f32 %v412_v52, %v2464_v24 }
 0x116   : > { %v1793_v1 = vadd.f32 %v1729_v59, %v1601_v54  ;;  %vm1119_vm0 = vmand %vm991_vm13, %vm1055_vm12  ;;  %v2294_v3 = vsel %vm1118_vm15, 1.0, %v2369_v34  ;;  %v1535_v27 = vsub.f32 %v412_v52, %v2466_v25  ;;  %v1662_v7 = vsub.f32 %v2464_v24, %v2171_v13 }
 0x117   : > { %v1863_v9 = vmul.f32 %v2526_v57, %v1792_v15  ;;  %v2295_v56 = vsel %vm1119_vm0, 1.0, %v2369_v34  ;;  %v1598_v5 = vmul.f32 %v2230_v62, %v1534_v0  ;;  %v1663_v60 = vsub.f32 %v2466_v25, %v2171_v13 }
 0x118   : > { %v1864_v2 = vmul.f32 %v2528_v58, %v1793_v1  ;;  %v1599_v10 = vmul.f32 %v2231_v63, %v1535_v27  ;;  %v1726_v11 = vmul.f32 %v2294_v3, %v1662_v7  ;;  %v382_v29 = vmul.f32 0.003937008, %v350_v38 }
 0x119   : > { %v1727_v22 = vmul.f32 %v2295_v56, %v1663_v60  ;;  %v352_v30 = vcvt.s32.f32 %v3204_v39  ;;  %v351_v31 = vcvt.s32.f32 %v3207_v40  ;;  %vm149_vm14 = vcmask 7168  }
 0x11a   : > { %v1987_v12 = vadd.f32 %v1864_v2, %v1863_v9  ;;  %v1790_v14 = vadd.f32 %v1726_v11, %v1598_v5  ;;  %v414_v16 = vadd.f32 0.003937008, %v382_v29  ;;  %v2173_v17 = vadd.f32 -0.003937008, %v382_v29  ;;  %152 = vst.msk [vmem:[%s3272_s17 + $0x10] sm:$0xff] %vm149_vm14, %v2369_v34  ;;  %v3373_v27 = vpop.xlane.xlu0 %1907  ;;  %v3384_v5 = vpop.xlane.xlu2 %1919 }
 0x11b   : > { %v1791_v18 = vadd.f32 %v1727_v22, %v1599_v10  ;;  %vm546_vm2 = vcmp.ge.f32.partialorder %v2464_v24, %v382_v29  ;;  %vm547_vm3 = vcmp.ge.f32.partialorder %v2466_v25, %v382_v29  ;;  %vm1058_vm1 = vcmp.lt.f32.partialorder %v2464_v24, %v382_v29  ;;  %150 = vst.msk [vmem:[%s3272_s17] sm:$0xff] %vm149_vm14, %v2369_v34 }
 0x11c   : > { %1988 = vadd.xlane.f32.xlu1 %v1987_v12  ;;  %v1861_v20 = vmul.f32 %v2526_v57, %v1790_v14  ;;  %vm610_vm9 = vcmp.lt.f32.partialorder %v2464_v24, %v414_v16  ;;  %vm611_vm4 = vcmp.lt.f32.partialorder %v2466_v25, %v414_v16  ;;  %vm994_vm5 = vcmp.ge.f32.partialorder %v2464_v24, %v2173_v17  ;;  %v3397_v10 = vpop.xlane.xlu1 %1925 }
 0x11d   : > { %v1862_v23 = vmul.f32 %v2528_v58, %v1791_v18  ;;  %vm674_vm6 = vmand %vm546_vm2, %vm610_vm9  ;;  %vm995_vm7 = vcmp.ge.f32.partialorder %v2466_v25, %v2173_v17  ;;  %vm1059_vm8 = vcmp.lt.f32.partialorder %v2466_v25, %v382_v29  ;;  %v1538_v32 = vsub.f32 %v414_v16, %v2464_v24  ;;  %151 = vst.msk [vmem:[%s3272_s17 + $0x8] sm:$0xff] %vm149_vm14, %v2369_v34 }
 0x11e   : > { %vm675_vm10 = vmand %vm547_vm3, %vm611_vm4  ;;  %v2234_v33 = vsel %vm674_vm6, 1.0, %v2369_v34  ;;  %v1539_v19 = vsub.f32 %v414_v16, %v2466_v25  ;;  %v1666_v35 = vsub.f32 %v2464_v24, %v2173_v17  ;;  %v1667_v36 = vsub.f32 %v2466_v25, %v2173_v17  ;;  %153 = vst.msk [vmem:[%s3272_s17 + $0x18] sm:$0xff] %vm149_vm14, %v2369_v34 }
 0x11f   : > { %v1984_v37 = vadd.f32 %v1862_v23, %v1861_v20  ;;  %v2235_v21 = vsel %vm675_vm10, 1.0, %v2369_v34  ;;  %vm1122_vm11 = vmand %vm994_vm5, %vm1058_vm1  ;;  %v1602_v61 = vmul.f32 %v2234_v33, %v1538_v32  ;;  %v384_v6 = vmul.f32 0.003937008, %v352_v30  ;;  %154 = vst.msk [vmem:[%s3272_s17 + $0x20] sm:$0xff] %vm149_vm14, %v2369_v34 }
 0x120   : > { %vm1123_vm13 = vmand %vm995_vm7, %vm1059_vm8  ;;  %v2298_v38 = vsel %vm1122_vm11, 1.0, %v2369_v34  ;;  %v1603_v40 = vmul.f32 %v2235_v21, %v1539_v19  ;;  %v3290_v28 = vmul.f32 0.003937008, %v351_v31  ;;  %vm480_vm0 = vcmp.lt.s32.totalorder %v3204_v39, 255  ;;  %155 = vst.msk [vmem:[%s3272_s17 + $0x28] sm:$0xff] %vm149_vm14, %v2369_v34 }
 0x121   : > { %1985 = vadd.xlane.f32.xlu0 %v1984_v37  ;;  %v2299_v41 = vsel %vm1123_vm13, 1.0, %v2369_v34  ;;  %v1730_v42 = vmul.f32 %v2298_v38, %v1666_v35  ;;  %v416_v43 = vadd.f32 0.003937008, %v384_v6  ;;  %v3283_v46 = vadd.f32 -0.003937008, %v384_v6  ;;  %156 = vst.msk [vmem:[%s3272_s17 + $0x30] sm:$0xff] %vm149_vm14, %v2369_v34 }
 0x122   : > { %v1731_v48 = vmul.f32 %v2299_v41, %v1667_v36  ;;  %vm550_vm12 = vcmp.ge.f32.partialorder %v2464_v24, %v384_v6  ;;  %vm551_vm15 = vcmp.ge.f32.partialorder %v2466_v25, %v384_v6  ;;  %vm1062_vm9 = vcmp.lt.f32.partialorder %v2464_v24, %v384_v6  ;;  %v1873_v63 = vld [vmem:[%s3272_s17 + $0x10] sm:$0xff]  ;;  %157 = vst.msk [vmem:[%s3272_s17 + $0x38] sm:$0xff] %vm149_vm14, %v2369_v34  ;;  %v1923_v32 = vpop.xlane.xlu0 %1922  ;;  %v1929_v35 = vpop.xlane.xlu2 %1928 }
 0x123   : > { %v1794_v49 = vadd.f32 %v1730_v42, %v1602_v61  ;;  %vm614_vm2 = vcmp.lt.f32.partialorder %v2464_v24, %v416_v43  ;;  %vm615_vm3 = vcmp.lt.f32.partialorder %v2466_v25, %v416_v43  ;;  %vm998_vm5 = vcmp.ge.f32.partialorder %v2464_v24, %v3283_v46  ;;  %158 = vst.msk [vmem:[%s3272_s17 + $0x40] sm:$0xff] %vm149_vm14, %v2369_v34 }
 0x124   : > { %v1795_v51 = vadd.f32 %v1731_v48, %v1603_v40  ;;  %vm678_vm1 = vmand %vm550_vm12, %vm614_vm2  ;;  %vm999_vm6 = vcmp.ge.f32.partialorder %v2466_v25, %v3283_v46  ;;  %vm1063_vm7 = vcmp.lt.f32.partialorder %v2466_v25, %v384_v6  ;;  %v1542_v45 = vsub.f32 %v416_v43, %v2464_v24  ;;  %159 = vst.msk [vmem:[%s3272_s17 + $0x48] sm:$0xff] %vm149_vm14, %v2369_v34  ;;  %v1935_v37 = vpop.xlane.xlu1 %1934  ;;  %v1871_v6 = vld [vmem:[%s3272_s17] sm:$0xff] }
 0x125   : > { %v1865_v52 = vmul.f32 %v2526_v57, %v1794_v49  ;;  %vm679_vm4 = vmand %vm551_vm15, %vm615_vm3  ;;  %v1543_v13 = vsub.f32 %v416_v43, %v2466_v25  ;;  %v415_v53 = vadd.f32 0.003937008, %v3290_v28  ;;  %v1670_v26 = vsub.f32 %v2464_v24, %v3283_v46  ;;  %160 = vst.msk [vmem:[%s3272_s17 + $0x50] sm:$0xff] %vm149_vm14, %v2369_v34  ;;  %v1874_v41 = vld [vmem:[%s3272_s17 + $0x18] sm:$0xff]  ;;  %v1872_v43 = vld [vmem:[%s3272_s17 + $0x8] sm:$0xff] }
 0x126   : > { %v1866_v44 = vmul.f32 %v2528_v58, %v1795_v51  ;;  %vm806_vm8 = vmand %vm678_vm1, %vm480_vm0  ;;  %v2174_v55 = vadd.f32 -0.003937008, %v3290_v28  ;;  %v1671_v15 = vsub.f32 %v2466_v25, %v3283_v46  ;;  %vm548_vm13 = vcmp.ge.f32.partialorder %v2464_v24, %v3290_v28  ;;  %161 = vst.msk [vmem:[%s3272_s17 + $0x58] sm:$0xff] %vm149_vm14, %v2369_v34  ;;  %v1875_v40 = vld [vmem:[%s3272_s17 + $0x20] sm:$0xff] }
 0x127   : > { %vm807_vm10 = vmand %vm679_vm4, %vm480_vm0  ;;  %v2238_v54 = vsel %vm806_vm8, 1.0, %v2369_v34  ;;  %vm549_vm15 = vcmp.ge.f32.partialorder %v2466_v25, %v3290_v28  ;;  %vm612_vm2 = vcmp.lt.f32.partialorder %v2464_v24, %v415_v53  ;;  %vm1060_vm3 = vcmp.lt.f32.partialorder %v2464_v24, %v3290_v28  ;;  %162 = vst.msk [vmem:[%s3272_s17 + $0x60] sm:$0xff] %vm149_vm14, %v2369_v34  ;;  %v1876_v48 = vld [vmem:[%s3272_s17 + $0x28] sm:$0xff] }
 0x128   : > { %v1990_v59 = vadd.f32 %v1866_v44, %v1865_v52  ;;  %v2239_v62 = vsel %vm807_vm10, 1.0, %v2369_v34  ;;  %vm1126_vm11 = vmand %vm998_vm5, %vm1062_vm9  ;;  %vm1061_vm1 = vcmp.lt.f32.partialorder %v2466_v25, %v3290_v28  ;;  %v1606_v0 = vmul.f32 %v2238_v54, %v1542_v45  ;;  %163 = vst.msk [vmem:[%s3272_s17 + $0x68] sm:$0xff] %vm149_vm14, %v2369_v34  ;;  %v1877_v51 = vld [vmem:[%s3272_s17 + $0x30] sm:$0xff] }
 0x129   : > { %vm1127_vm12 = vmand %vm999_vm6, %vm1063_vm7  ;;  %v1607_v1 = vmul.f32 %v2239_v62, %v1543_v13  ;;  %vm613_vm4 = vcmp.lt.f32.partialorder %v2466_v25, %v415_v53  ;;  %v1540_v3 = vsub.f32 %v415_v53, %v2464_v24  ;;  %vm996_vm6 = vcmp.ge.f32.partialorder %v2464_v24, %v2174_v55  ;;  %164 = vst.msk [vmem:[%s3272_s17 + $0x70] sm:$0xff] %vm149_vm14, %v2369_v34  ;;  %v1878_v49 = vld [vmem:[%s3272_s17 + $0x38] sm:$0xff] }
 0x12a   : > { %1991 = vadd.xlane.f32.xlu2 %v1990_v59  ;;  %vm1350_vm9 = vmand %vm1126_vm11, %vm480_vm0  ;;  %v1541_v9 = vsub.f32 %v415_v53, %v2466_v25  ;;  %v2001_v56 = vadd.f32 %v3255_v4, %v1873_v63  ;;  %vm997_vm7 = vcmp.ge.f32.partialorder %v2466_v25, %v2174_v55  ;;  %v1668_v39 = vsub.f32 %v2464_v24, %v2174_v55  ;;  %v1938_v61 = vpop.xlane.xlu2 %1937  ;;  %v1879_v44 = vld [vmem:[%s3272_s17 + $0x40] sm:$0xff] }
 0x12b   : > { %vm1351_vm5 = vmand %vm1127_vm12, %vm480_vm0  ;;  %v2302_v7 = vsel %vm1350_vm9, 1.0, %v2369_v34  ;;  %v1669_v22 = vsub.f32 %v2466_v25, %v2174_v55  ;;  %165 = vst.msk [vmem:[%s3272_s17 + $0x78] sm:$0xff] %vm149_vm14, %v2369_v34  ;;  %v1999_v42 = vadd.f32 %v3295_v8, %v1871_v6  ;;  %v2003_v46 = vadd.f32 %v3303_v50, %v1875_v40  ;;  %v1880_v54 = vld [vmem:[%s3272_s17 + $0x48] sm:$0xff] }
 0x12c   : > { %v2303_v60 = vsel %vm1351_vm5, 1.0, %v2369_v34  ;;  %v1734_v2 = vmul.f32 %v2302_v7, %v1670_v26  ;;  %vm676_vm0 = vmand %vm548_vm13, %vm612_vm2  ;;  %2034 = vst.msk [vmem:[%s3272_s17 + $0x10] sm:$0xff] %vm149_vm14, %v2001_v56  ;;  %v1944_v38 = vpop.xlane.xlu1 %1943  ;;  %v2002_v28 = vadd.f32 %v3309_v47, %v1874_v41  ;;  %v2000_v8 = vadd.f32 %v3373_v27, %v1872_v43  ;;  %v1881_v45 = vld [vmem:[%s3272_s17 + $0x50] sm:$0xff] }
 0x12d   : > { %v1735_v11 = vmul.f32 %v2303_v60, %v1671_v15  ;;  %vm677_vm8 = vmand %vm549_vm15, %vm613_vm4  ;;  %v2236_v29 = vsel %vm676_vm0, 1.0, %v2369_v34  ;;  %166 = vst.msk [vmem:[%s3272_s17 + $0x80] sm:$0xff] %vm149_vm14, %v2369_v34  ;;  %v2004_v50 = vadd.f32 %v3384_v5, %v1876_v48  ;;  %v2005_v53 = vadd.f32 %v1923_v32, %v1877_v51  ;;  %v1882_v55 = vld [vmem:[%s3272_s17 + $0x58] sm:$0xff] }
 0x12e   : > { %v1798_v30 = vadd.f32 %v1734_v2, %v1606_v0  ;;  %v2237_v31 = vsel %vm677_vm8, 1.0, %v2369_v34  ;;  %vm1124_vm10 = vmand %vm996_vm6, %vm1060_vm3  ;;  %v1604_v12 = vmul.f32 %v2236_v29, %v1540_v3  ;;  %167 = vst.msk [vmem:[%s3272_s17 + $0x88] sm:$0xff] %vm149_vm14, %v2369_v34  ;;  %v2007_v26 = vadd.f32 %v1929_v35, %v1879_v44  ;;  %v1883_v63 = vld [vmem:[%s3272_s17 + $0x60] sm:$0xff] }
 0x12f   : > { %v1799_v14 = vadd.f32 %v1735_v11, %v1607_v1  ;;  %vm1125_vm11 = vmand %vm997_vm7, %vm1061_vm1  ;;  %v2300_v16 = vsel %vm1124_vm10, 1.0, %v2369_v34  ;;  %v1605_v17 = vmul.f32 %v2237_v31, %v1541_v9  ;;  %168 = vst.msk [vmem:[%s3272_s17 + $0x90] sm:$0xff] %vm149_vm14, %v2369_v34  ;;  %v2009_v59 = vadd.f32 %v1935_v37, %v1881_v45  ;;  %v1884_v62 = vld [vmem:[%s3272_s17 + $0x68] sm:$0xff] }
 0x130   : > { %v1869_v24 = vmul.f32 %v2526_v57, %v1798_v30  ;;  %v2301_v4 = vsel %vm1125_vm11, 1.0, %v2369_v34  ;;  %v1732_v18 = vmul.f32 %v2300_v16, %v1668_v39  ;;  %169 = vst.msk [vmem:[%s3272_s17 + $0x98] sm:$0xff] %vm149_vm14, %v2369_v34  ;;  %v2010_v0 = vadd.f32 %v1938_v61, %v1882_v55  ;;  %v1885_v1 = vld [vmem:[%s3272_s17 + $0x70] sm:$0xff] }
 0x131   : > { %v1870_v25 = vmul.f32 %v2528_v58, %v1799_v14  ;;  %v1733_v20 = vmul.f32 %v2301_v4, %v1669_v22  ;;  %170 = vst.msk [vmem:[%s3272_s17 + $0xa0] sm:$0xff] %vm149_vm14, %v2369_v34  ;;  %v2012_v3 = vadd.f32 %v1944_v38, %v1884_v62 }
 0x132   : > { %v1796_v23 = vadd.f32 %v1732_v18, %v1604_v12  ;;  %171 = vst.msk [vmem:[%s3272_s17 + $0xa8] sm:$0xff] %vm149_vm14, %v2369_v34  ;;  %v1947_v47 = vpop.xlane.xlu2 %1946  ;;  %v1886_v56 = vld [vmem:[%s3272_s17 + $0x78] sm:$0xff] }
 0x133   : > { %v1996_v33 = vadd.f32 %v1870_v25, %v1869_v24  ;;  %v1797_v19 = vadd.f32 %v1733_v20, %v1605_v17  ;;  %172 = vst.msk [vmem:[%s3272_s17 + $0xb0] sm:$0xff] %vm149_vm14, %v2369_v34  ;;  %v2013_v5 = vadd.f32 %v1947_v47, %v1885_v1 }
 0x134   : > { %v1867_v36 = vmul.f32 %v2526_v57, %v1796_v23  ;;  %173 = vst.msk [vmem:[%s3272_s17 + $0xb8] sm:$0xff] %vm149_vm14, %v2369_v34  ;;  %v1887_v27 = vld [vmem:[%s3272_s17 + $0x80] sm:$0xff] }
 0x135   : > { %1997 = vadd.xlane.f32.xlu1 %v1996_v33  ;;  %v1868_v21 = vmul.f32 %v2528_v58, %v1797_v19  ;;  %v1932_v58 = vpop.xlane.xlu0 %1931  ;;  %174 = vst.msk [vmem:[%s3272_s17 + $0xc0] sm:$0xff] %vm149_vm14, %v2369_v34  ;;  %v1888_v60 = vld [vmem:[%s3272_s17 + $0x88] sm:$0xff] }
 0x136   : > { %175 = vst.msk [vmem:[%s3272_s17 + $0xc8] sm:$0xff] %vm149_vm14, %v2369_v34  ;;  %v1953_v13 = vpop.xlane.xlu1 %1952  ;;  %v2008_v15 = vadd.f32 %v1932_v58, %v1880_v54  ;;  %v1889_v31 = vld [vmem:[%s3272_s17 + $0x90] sm:$0xff] }
 0x137   : > { %v1993_v57 = vadd.f32 %v1868_v21, %v1867_v36  ;;  %176 = vst.msk [vmem:[%s3272_s17 + $0xd0] sm:$0xff] %vm149_vm14, %v2369_v34  ;;  %v2015_v39 = vadd.f32 %v1953_v13, %v1887_v27 }
 0x138   : > { %177 = vst.msk [vmem:[%s3272_s17 + $0xd8] sm:$0xff] %vm149_vm14, %v2369_v34  ;;  %v1891_v16 = vld [vmem:[%s3272_s17 + $0xa0] sm:$0xff] }
 0x139   : > { %1994 = vadd.xlane.f32.xlu0 %v1993_v57  ;;  %178 = vst.msk [vmem:[%s3272_s17 + $0xe0] sm:$0xff] %vm149_vm14, %v2369_v34  ;;  %v1892_v20 = vld [vmem:[%s3272_s17 + $0xa8] sm:$0xff] }
 0x13a   : > { %179 = vst.msk [vmem:[%s3272_s17 + $0xe8] sm:$0xff] %vm149_vm14, %v2369_v34  ;;  %v1893_v4 = vld [vmem:[%s3272_s17 + $0xb0] sm:$0xff] }
 0x13b   : > { %180 = vst.msk [vmem:[%s3272_s17 + $0xf0] sm:$0xff] %vm149_vm14, %v2369_v34  ;;  %v1894_v33 = vld [vmem:[%s3272_s17 + $0xb8] sm:$0xff] }
 0x13c   : > { %181 = vst.msk [vmem:[%s3272_s17 + $0xf8] sm:$0xff] %vm149_vm14, %v2369_v34  ;;  %v2006_v34 = vadd.f32 %v3397_v10, %v1878_v49  ;;  %v1890_v10 = vld [vmem:[%s3272_s17 + $0x98] sm:$0xff]  ;;  %v1895_v57 = vld [vmem:[%s3272_s17 + $0xc0] sm:$0xff] }
 0x13d   : > { %v1941_v52 = vpop.xlane.xlu0 %1940  ;;  %2032 = vst.msk [vmem:[%s3272_s17] sm:$0xff] %vm149_vm14, %v1999_v42  ;;  %v1896_v36 = vld [vmem:[%s3272_s17 + $0xc8] sm:$0xff] }
 0x13e   : > { %2036 = vst.msk [vmem:[%s3272_s17 + $0x20] sm:$0xff] %vm149_vm14, %v2003_v46  ;;  %v2011_v9 = vadd.f32 %v1941_v52, %v1883_v63  ;;  %v1897_v6 = vld [vmem:[%s3272_s17 + $0xd0] sm:$0xff] }
 0x13f   : > { %2035 = vst.msk [vmem:[%s3272_s17 + $0x18] sm:$0xff] %vm149_vm14, %v2002_v28  ;;  %v1898_v46 = vld [vmem:[%s3272_s17 + $0xd8] sm:$0xff] }
 0x140   : > { %2033 = vst.msk [vmem:[%s3272_s17 + $0x8] sm:$0xff] %vm149_vm14, %v2000_v8  ;;  %v1899_v41 = vld [vmem:[%s3272_s17 + $0xe0] sm:$0xff] }
 0x141   : > { %2037 = vst.msk [vmem:[%s3272_s17 + $0x28] sm:$0xff] %vm149_vm14, %v2004_v50  ;;  %v1900_v49 = vld [vmem:[%s3272_s17 + $0xe8] sm:$0xff] }
 0x142   : > { %2039 = vst.msk [vmem:[%s3272_s17 + $0x38] sm:$0xff] %vm149_vm14, %v2006_v34  ;;  %v1956_v2 = vpop.xlane.xlu2 %1955  ;;  %v1901_v47 = vld [vmem:[%s3272_s17 + $0xf0] sm:$0xff] }
 0x143   : > { %2038 = vst.msk [vmem:[%s3272_s17 + $0x30] sm:$0xff] %vm149_vm14, %v2005_v53  ;;  %v2016_v22 = vadd.f32 %v1956_v2, %v1888_v60  ;;  %v1902_v52 = vld [vmem:[%s3272_s17 + $0xf8] sm:$0xff] }
 0x144   : > { %2040 = vst.msk [vmem:[%s3272_s17 + $0x40] sm:$0xff] %vm149_vm14, %v2007_v26 }
 0x145   : > { %v1950_v7 = vpop.xlane.xlu0 %1949  ;;  %2042 = vst.msk [vmem:[%s3272_s17 + $0x50] sm:$0xff] %vm149_vm14, %v2009_v59 }
 0x146   : > { %2041 = vst.msk [vmem:[%s3272_s17 + $0x48] sm:$0xff] %vm149_vm14, %v2008_v15  ;;  %v2014_v29 = vadd.f32 %v1950_v7, %v1886_v56 }
 0x147   : > { %2043 = vst.msk [vmem:[%s3272_s17 + $0x58] sm:$0xff] %vm149_vm14, %v2010_v0 }
 0x148   : > { %2045 = vst.msk [vmem:[%s3272_s17 + $0x68] sm:$0xff] %vm149_vm14, %v2012_v3 }
 0x149   : > { %v1962_v11 = vpop.xlane.xlu1 %1961  ;;  %2044 = vst.msk [vmem:[%s3272_s17 + $0x60] sm:$0xff] %vm149_vm14, %v2011_v9 }
 0x14a   : > { %2046 = vst.msk [vmem:[%s3272_s17 + $0x70] sm:$0xff] %vm149_vm14, %v2013_v5  ;;  %v2018_v30 = vadd.f32 %v1962_v11, %v1890_v10 }
 0x14b   : > { %2048 = vst.msk [vmem:[%s3272_s17 + $0x80] sm:$0xff] %vm149_vm14, %v2015_v39 }
 0x14c   : > { %2047 = vst.msk [vmem:[%s3272_s17 + $0x78] sm:$0xff] %vm149_vm14, %v2014_v29 }
 0x14d   : > { %2049 = vst.msk [vmem:[%s3272_s17 + $0x88] sm:$0xff] %vm149_vm14, %v2016_v22 }
 0x14e   : > { %2051 = vst.msk [vmem:[%s3272_s17 + $0x98] sm:$0xff] %vm149_vm14, %v2018_v30 }
 0x151   : > { %v1959_v12 = vpop.xlane.xlu0 %1958 }
 0x152   : > { %v2017_v14 = vadd.f32 %v1959_v12, %v1889_v31 }
 0x154   : > { %2050 = vst.msk [vmem:[%s3272_s17 + $0x90] sm:$0xff] %vm149_vm14, %v2017_v14 }
 0x15a   : > { %v1965_v17 = vpop.xlane.xlu2 %1964 }
 0x15b   : > { %v2019_v24 = vadd.f32 %v1965_v17, %v1891_v16 }
 0x15d   : > { %2052 = vst.msk [vmem:[%s3272_s17 + $0xa0] sm:$0xff] %vm149_vm14, %v2019_v24 }
 0x15f   : > { %v1971_v18 = vpop.xlane.xlu1 %1970 }
 0x160   : > { %v2021_v25 = vadd.f32 %v1971_v18, %v1893_v4 }
 0x162   : > { %2054 = vst.msk [vmem:[%s3272_s17 + $0xb0] sm:$0xff] %vm149_vm14, %v2021_v25 }
 0x169   : > { %v1968_v23 = vpop.xlane.xlu0 %1967 }
 0x16a   : > { %v2020_v32 = vadd.f32 %v1968_v23, %v1892_v20 }
 0x16c   : > { %2053 = vst.msk [vmem:[%s3272_s17 + $0xa8] sm:$0xff] %vm149_vm14, %v2020_v32 }
 0x16f   : > { %v1974_v19 = vpop.xlane.xlu2 %1973 }
 0x170   : > { %v2022_v35 = vadd.f32 %v1974_v19, %v1894_v33 }
 0x172   : > { %2055 = vst.msk [vmem:[%s3272_s17 + $0xb8] sm:$0xff] %vm149_vm14, %v2022_v35 }
 0x176   : > { %v1980_v37 = vpop.xlane.xlu1 %1979 }
 0x177   : > { %v2024_v21 = vadd.f32 %v1980_v37, %v1896_v36 }
 0x179   : > { %2057 = vst.msk [vmem:[%s3272_s17 + $0xc8] sm:$0xff] %vm149_vm14, %v2024_v21 }
 0x17e   : > { %v1977_v58 = vpop.xlane.xlu0 %1976 }
 0x17f   : > { %v2023_v61 = vadd.f32 %v1977_v58, %v1895_v57 }
 0x181   : > { %2056 = vst.msk [vmem:[%s3272_s17 + $0xc0] sm:$0xff] %vm149_vm14, %v2023_v61 }
 0x185   : > { %v1983_v38 = vpop.xlane.xlu2 %1982 }
 0x186   : > { %v2025_v40 = vadd.f32 %v1983_v38, %v1897_v6 }
 0x188   : > { %2058 = vst.msk [vmem:[%s3272_s17 + $0xd0] sm:$0xff] %vm149_vm14, %v2025_v40 }
 0x18f   : > { %v1989_v42 = vpop.xlane.xlu1 %1988 }
 0x190   : > { %v2027_v43 = vadd.f32 %v1989_v42, %v1899_v41 }
 0x192   : > { %2060 = vst.msk [vmem:[%s3272_s17 + $0xe0] sm:$0xff] %vm149_vm14, %v2027_v43 }
 0x194   : > { %v1986_v48 = vpop.xlane.xlu0 %1985 }
 0x195   : > { %v2026_v28 = vadd.f32 %v1986_v48, %v1898_v46 }
 0x197   : > { %2059 = vst.msk [vmem:[%s3272_s17 + $0xd8] sm:$0xff] %vm149_vm14, %v2026_v28 }
 0x19d   : > { %v1992_v8 = vpop.xlane.xlu2 %1991 }
 0x19e   : > { %v2028_v51 = vadd.f32 %v1992_v8, %v1900_v49 }
 0x1a0   : > { %2061 = vst.msk [vmem:[%s3272_s17 + $0xe8] sm:$0xff] %vm149_vm14, %v2028_v51 }
 0x1a8   : > { %v1998_v50 = vpop.xlane.xlu1 %1997 }
 0x1a9   : > { %v2030_v44 = vadd.f32 %v1998_v50, %v1902_v52 }
 0x1ab   : > { %2063 = vst.msk [vmem:[%s3272_s17 + $0xf8] sm:$0xff] %vm149_vm14, %v2030_v44 }
 0x1ac   : > { %v1995_v34 = vpop.xlane.xlu0 %1994 }
 0x1ad   : > { %v2029_v45 = vadd.f32 %v1995_v34, %v1901_v47 }
 0x1af   : > { %2062 = vst.msk [vmem:[%s3272_s17 + $0xf0] sm:$0xff] %vm149_vm14, %v2029_v45 }
 0x1b0 PF: > { %s11_s8 = sadd.s32 1, %s2364_s8   ;;  %s3600_s6 = smov %s2360_s7 }
 0x1b1   : > { %p8_p5 = scmp.ge.s32.totalorder %s11_s8, 4   ;;  %s3601_s7 = smov %s3603_s9 }
 0x1b3   :  { %10 = sbr.rel (!%p8_p5) target bundleno = 2 (0x2), region = 58 }

</bundles_post_ra>
